<compile_context>
chip_gen: v5e
topology: v5e:2x2
jax: 0.10.0
libtpu: 0.0.40
codegen_flags: <defaults>
</compile_context>

<pallas_src>
import functools

import jax
import jax.numpy as jnp
from jax.experimental import pallas as pl
from jax.experimental.pallas import tpu as pltpu


def _round_up(v, m):
    return -(-v // m) * m


def _conv3x3_bn_relu_kernel(x_ref, w_ref, scale_ref, bias_ref, o_ref, patch_ref,
                            *, stride, TH, Wo, Cin):
    # x_ref:     (Hp, Wp, Cin)      padded input for one batch element (resident per n)
    # w_ref:     (9*Cin, Coutp)     3x3 taps folded into the contraction dim
    # scale_ref: (1, Coutp)  f32    folded BN scale
    # bias_ref:  (1, Coutp)  f32    folded (conv bias + BN shift)
    # o_ref:     (TH, Wo, Coutp)    one output row tile
    # patch_ref: (TH*Wo, 9*Cin)     VMEM scratch: im2col patch for this tile
    r = pl.program_id(1)
    coutp = o_ref.shape[-1]
    wp = x_ref.shape[1]
    row0 = r * (TH * stride)

    # Build the im2col patch with contiguous loads only (no strided Ref reads).
    for kh in range(3):
        if stride == 1:
            rows = x_ref[pl.ds(row0 + kh, TH), :, :]                  # (TH, Wp, Cin)
        else:
            rows = x_ref[pl.ds(row0 + kh, TH * stride), :, :]         # (TH*s, Wp, Cin)
            rows = rows.reshape(TH, stride, wp, Cin)[:, 0]            # pick phase 0 rows
        for kw in range(3):
            if stride == 1:
                p = rows[:, kw:kw + Wo, :]                            # (TH, Wo, Cin)
            else:
                p = rows[:, kw:kw + Wo * stride, :]
                p = p.reshape(TH, Wo, stride, Cin)[:, :, 0, :]        # pick phase 0 cols
            c0 = (kh * 3 + kw) * Cin
            patch_ref[:, c0:c0 + Cin] = p.reshape(TH * Wo, Cin)

    # Single MXU matmul with K = 9*Cin, accumulated in f32.
    acc = jnp.dot(patch_ref[...], w_ref[...], preferred_element_type=jnp.float32)

    # Folded BN + bias + ReLU epilogue in f32 (lane-dense, Coutp is a multiple of 128).
    y = jnp.maximum(acc * scale_ref[...] + bias_ref[...], 0.0)
    o_ref[...] = y.reshape(TH, Wo, coutp).astype(o_ref.dtype)


def conv_bn_relu(x_nchw, weight_oihw, conv_bias, gamma, beta, run_mean, run_var,
                 stride, eps=1e-5, compute_dtype=jnp.bfloat16):
    """Forward of the PyTorch `conv` module: Conv2d(3x3, pad=1, stride) + BN(eval) + ReLU."""
    N, Cin, H, W = x_nchw.shape
    Cout = weight_oihw.shape[0]
    s = int(stride)

    Ho = (H - 1) // s + 1
    Wo = (W - 1) // s + 1

    # Lane-dense output channels; sublane-friendly output width.
    Coutp = _round_up(Cout, 128)
    Wop = _round_up(Wo, 8)
    # Row tile: keep the (TH*Wop, Coutp) f32 accumulator within the vreg budget.
    TH = max(1, min(Ho, 128 // Wop)) if Wop <= 128 else 1
    Hop = _round_up(Ho, TH)
    n_rt = Hop // TH

    # Spatial padding: conv padding=1 plus enough extra zero rows/cols so every
    # tile's contiguous in-kernel reads stay in bounds.
    Hp = max(H + 2, Hop * s + 2)
    Wp = max(W + 2, Wop * s + 2)

    # NCHW -> NHWC, pad, cast (single fused XLA pass).
    x = jnp.transpose(x_nchw, (0, 2, 3, 1)).astype(compute_dtype)
    xp = jnp.pad(x, ((0, 0), (1, Hp - H - 1), (1, Wp - W - 1), (0, 0)))

    # OIHW -> HWIO -> (9*Cin, Coutp): taps folded into the MXU K dim, Cout padded.
    w = jnp.transpose(weight_oihw, (2, 3, 1, 0)).reshape(9 * Cin, Cout)
    w = jnp.pad(w, ((0, 0), (0, Coutp - Cout))).astype(compute_dtype)

    # Fold BN (inference / running stats) and conv bias into per-channel scale / bias.
    scale = gamma / jnp.sqrt(run_var + eps)                       # (Cout,)
    bias_eff = (conv_bias - run_mean) * scale + beta              # (Cout,)
    scale2 = jnp.pad(scale, (0, Coutp - Cout)).reshape(1, Coutp).astype(jnp.float32)
    bias2 = jnp.pad(bias_eff, (0, Coutp - Cout)).reshape(1, Coutp).astype(jnp.float32)

    kernel = functools.partial(_conv3x3_bn_relu_kernel,
                               stride=s, TH=TH, Wo=Wop, Cin=Cin)

    flops = 2 * 9 * N * Ho * Wo * Cin * Cout
    bytes_accessed = (xp.size * xp.dtype.itemsize + w.size * w.dtype.itemsize
                      + N * Hop * Wop * Coutp * 4)

    out_nhwc = pl.pallas_call(
        kernel,
        out_shape=jax.ShapeDtypeStruct((N, Hop, Wop, Coutp), jnp.float32),
        grid_spec=pltpu.PrefetchScalarGridSpec(
            num_scalar_prefetch=0,
            grid=(N, n_rt),
            in_specs=[
                # Padded image: resident in VMEM across the row-tile axis.
                pl.BlockSpec((None, Hp, Wp, Cin), lambda n, r: (n, 0, 0, 0)),
                pl.BlockSpec((9 * Cin, Coutp), lambda n, r: (0, 0)),
                pl.BlockSpec((1, Coutp), lambda n, r: (0, 0)),
                pl.BlockSpec((1, Coutp), lambda n, r: (0, 0)),
            ],
            out_specs=pl.BlockSpec((None, TH, Wop, Coutp), lambda n, r: (n, r, 0, 0)),
            scratch_shapes=[pltpu.VMEM((TH * Wop, 9 * Cin), compute_dtype)],
        ),
        compiler_params=pltpu.CompilerParams(
            dimension_semantics=("parallel", "parallel"),
            vmem_limit_bytes=48 * 1024 * 1024,  # stay under v7x's 64 MiB VMEM
        ),
        cost_estimate=pl.CostEstimate(flops=flops, transcendentals=0,
                                      bytes_accessed=bytes_accessed),
    )(xp, w, scale2, bias2)

    # Drop channel / spatial padding, NHWC -> NCHW to match the PyTorch module.
    out_nhwc = out_nhwc[:, :Ho, :Wo, :Cout]
    return jnp.transpose(out_nhwc, (0, 3, 1, 2))


def _reference(x, weight, conv_bias, gamma, beta, run_mean, run_var, stride, eps=1e-5):
    y = jax.lax.conv_general_dilated(
        x, weight, window_strides=(stride, stride), padding=((1, 1), (1, 1)),
        dimension_numbers=("NCHW", "OIHW", "NCHW"))
    y = y + conv_bias.reshape(1, -1, 1, 1)
    y = (y - run_mean.reshape(1, -1, 1, 1)) / jnp.sqrt(run_var + eps).reshape(1, -1, 1, 1)
    y = y * gamma.reshape(1, -1, 1, 1) + beta.reshape(1, -1, 1, 1)
    return jnp.maximum(y, 0.0)


if __name__ == "__main__":
    key = jax.random.PRNGKey(0)
    k_x, k_w, k_b, k_g, k_be, k_m, k_v = jax.random.split(key, 7)

    N, in_ch, H, W = 2, 4, 16, 16
    out_ch = 8

    x = jax.random.normal(k_x, (N, in_ch, H, W), jnp.float32)
    # Shapes match nn.Conv2d(in_ch, out_ch, 3, padding=1) + nn.BatchNorm2d(out_ch).
    weight = jax.random.normal(k_w, (out_ch, in_ch, 3, 3), jnp.float32) * 0.1
    conv_bias = jax.random.normal(k_b, (out_ch,), jnp.float32) * 0.1
    gamma = 1.0 + 0.1 * jax.random.normal(k_g, (out_ch,), jnp.float32)
    beta = 0.1 * jax.random.normal(k_be, (out_ch,), jnp.float32)
    run_mean = 0.1 * jax.random.normal(k_m, (out_ch,), jnp.float32)
    run_var = jnp.abs(jax.random.normal(k_v, (out_ch,), jnp.float32)) + 0.5

    # stride=1, bf16 compute (default fast path) vs f32 reference.
    out = jax.block_until_ready(
        conv_bn_relu(x, weight, conv_bias, gamma, beta, run_mean, run_var, 1))
    ref = _reference(x, weight, conv_bias, gamma, beta, run_mean, run_var, 1)
    assert out.shape == ref.shape == (N, out_ch, H, W)
    assert jnp.allclose(out, ref, atol=3e-2, rtol=3e-2), float(jnp.max(jnp.abs(out - ref)))

    # stride=1, f32 compute: tight numerical check of the kernel itself.
    out32 = jax.block_until_ready(
        conv_bn_relu(x, weight, conv_bias, gamma, beta, run_mean, run_var, 1,
                     compute_dtype=jnp.float32))
    assert jnp.allclose(out32, ref, atol=1e-4, rtol=1e-4), \
        float(jnp.max(jnp.abs(out32 - ref)))

    # stride=2 path (previously untested), f32 compute.
    out_s2 = jax.block_until_ready(
        conv_bn_relu(x, weight, conv_bias, gamma, beta, run_mean, run_var, 2,
                     compute_dtype=jnp.float32))
    ref_s2 = _reference(x, weight, conv_bias, gamma, beta, run_mean, run_var, 2)
    assert out_s2.shape == ref_s2.shape == (N, out_ch, H // 2, W // 2)
    assert jnp.allclose(out_s2, ref_s2, atol=1e-4, rtol=1e-4), \
        float(jnp.max(jnp.abs(out_s2 - ref_s2)))

    print("KERNEL_OK")
</pallas_src>

<mosaic_0001>
module attributes {stable_mosaic.version = 11 : i64} {
  func.func @_conv3x3_bn_relu_kernel(%arg0: i32, %arg1: i32, %arg2: memref<1x18x18x4xbf16, #tpu.memory_space<vmem>>, %arg3: memref<36x128xbf16, #tpu.memory_space<vmem>>, %arg4: memref<1x128xf32, #tpu.memory_space<vmem>>, %arg5: memref<1x128xf32, #tpu.memory_space<vmem>>, %arg6: memref<1x8x16x128xf32, #tpu.memory_space<vmem>>, %arg7: memref<128x36xbf16, #tpu.memory_space<vmem>>) attributes {dimension_semantics = [#tpu.dimension_semantics<parallel>, #tpu.dimension_semantics<parallel>], iteration_bounds = array<i64: 2, 2>, scalar_prefetch = 0 : i64, scratch_operands = 1 : i64, tpu.core_type = #tpu.core_type<tc>, window_params = [{transform_indices = @transform_0, window_bounds = array<i64: 1, 18, 18, 4>}, {pipeline_mode = #tpu.pipeline_mode<synchronous>, transform_indices = @transform_1, window_bounds = array<i64: 36, 128>}, {pipeline_mode = #tpu.pipeline_mode<synchronous>, transform_indices = @transform_2, window_bounds = array<i64: 1, 128>}, {pipeline_mode = #tpu.pipeline_mode<synchronous>, transform_indices = @transform_3, window_bounds = array<i64: 1, 128>}, {transform_indices = @transform_4, window_bounds = array<i64: 1, 8, 16, 128>}]} {
    %c8_i32 = arith.constant 8 : i32
    %0 = arith.muli %arg1, %c8_i32 : i32
    %c0_i32 = arith.constant 0 : i32
    %1 = arith.addi %0, %c0_i32 : i32
    %c0 = arith.constant 0 : index
    %2 = arith.index_cast %1 : i32 to index
    %c0_0 = arith.constant 0 : index
    %c0_1 = arith.constant 0 : index
    %3 = vector.load %arg2[%c0, %2, %c0_0, %c0_1] : memref<1x18x18x4xbf16, #tpu.memory_space<vmem>>, vector<1x8x18x4xbf16>
    %4 = vector.shape_cast %3 : vector<1x8x18x4xbf16> to vector<8x18x4xbf16>
    %5 = vector.extract_strided_slice %4 {offsets = [0, 0, 0], sizes = [8, 16, 4], strides = [1, 1, 1]} : vector<8x18x4xbf16> to vector<8x16x4xbf16>
    %6 = vector.shape_cast %5 : vector<8x16x4xbf16> to vector<128x4xbf16>
    %c0_2 = arith.constant 0 : index
    %c0_3 = arith.constant 0 : index
    %7 = vector.load %arg7[%c0_2, %c0_3] : memref<128x36xbf16, #tpu.memory_space<vmem>>, vector<128x4xbf16>
    tpu.vector_store %arg7[%c0_2, %c0_3], %6 {strides = array<i32>} : memref<128x36xbf16, #tpu.memory_space<vmem>>, vector<128x4xbf16>,
    %8 = vector.extract_strided_slice %4 {offsets = [0, 1, 0], sizes = [8, 16, 4], strides = [1, 1, 1]} : vector<8x18x4xbf16> to vector<8x16x4xbf16>
    %9 = vector.shape_cast %8 : vector<8x16x4xbf16> to vector<128x4xbf16>
    %c0_4 = arith.constant 0 : index
    %c4 = arith.constant 4 : index
    %10 = vector.load %arg7[%c0_4, %c4] : memref<128x36xbf16, #tpu.memory_space<vmem>>, vector<128x4xbf16>
    tpu.vector_store %arg7[%c0_4, %c4], %9 {strides = array<i32>} : memref<128x36xbf16, #tpu.memory_space<vmem>>, vector<128x4xbf16>,
    %11 = vector.extract_strided_slice %4 {offsets = [0, 2, 0], sizes = [8, 16, 4], strides = [1, 1, 1]} : vector<8x18x4xbf16> to vector<8x16x4xbf16>
    %12 = vector.shape_cast %11 : vector<8x16x4xbf16> to vector<128x4xbf16>
    %c0_5 = arith.constant 0 : index
    %c8 = arith.constant 8 : index
    %13 = vector.load %arg7[%c0_5, %c8] : memref<128x36xbf16, #tpu.memory_space<vmem>>, vector<128x4xbf16>
    tpu.vector_store %arg7[%c0_5, %c8], %12 {strides = array<i32>} : memref<128x36xbf16, #tpu.memory_space<vmem>>, vector<128x4xbf16>,
    %c1_i32 = arith.constant 1 : i32
    %14 = arith.addi %0, %c1_i32 : i32
    %c0_6 = arith.constant 0 : index
    %15 = arith.index_cast %14 : i32 to index
    %c0_7 = arith.constant 0 : index
    %c0_8 = arith.constant 0 : index
    %16 = vector.load %arg2[%c0_6, %15, %c0_7, %c0_8] : memref<1x18x18x4xbf16, #tpu.memory_space<vmem>>, vector<1x8x18x4xbf16>
    %17 = vector.shape_cast %16 : vector<1x8x18x4xbf16> to vector<8x18x4xbf16>
    %18 = vector.extract_strided_slice %17 {offsets = [0, 0, 0], sizes = [8, 16, 4], strides = [1, 1, 1]} : vector<8x18x4xbf16> to vector<8x16x4xbf16>
    %19 = vector.shape_cast %18 : vector<8x16x4xbf16> to vector<128x4xbf16>
    %c0_9 = arith.constant 0 : index
    %c12 = arith.constant 12 : index
    %20 = vector.load %arg7[%c0_9, %c12] : memref<128x36xbf16, #tpu.memory_space<vmem>>, vector<128x4xbf16>
    tpu.vector_store %arg7[%c0_9, %c12], %19 {strides = array<i32>} : memref<128x36xbf16, #tpu.memory_space<vmem>>, vector<128x4xbf16>,
    %21 = vector.extract_strided_slice %17 {offsets = [0, 1, 0], sizes = [8, 16, 4], strides = [1, 1, 1]} : vector<8x18x4xbf16> to vector<8x16x4xbf16>
    %22 = vector.shape_cast %21 : vector<8x16x4xbf16> to vector<128x4xbf16>
    %c0_10 = arith.constant 0 : index
    %c16 = arith.constant 16 : index
    %23 = vector.load %arg7[%c0_10, %c16] : memref<128x36xbf16, #tpu.memory_space<vmem>>, vector<128x4xbf16>
    tpu.vector_store %arg7[%c0_10, %c16], %22 {strides = array<i32>} : memref<128x36xbf16, #tpu.memory_space<vmem>>, vector<128x4xbf16>,
    %24 = vector.extract_strided_slice %17 {offsets = [0, 2, 0], sizes = [8, 16, 4], strides = [1, 1, 1]} : vector<8x18x4xbf16> to vector<8x16x4xbf16>
    %25 = vector.shape_cast %24 : vector<8x16x4xbf16> to vector<128x4xbf16>
    %c0_11 = arith.constant 0 : index
    %c20 = arith.constant 20 : index
    %26 = vector.load %arg7[%c0_11, %c20] : memref<128x36xbf16, #tpu.memory_space<vmem>>, vector<128x4xbf16>
    tpu.vector_store %arg7[%c0_11, %c20], %25 {strides = array<i32>} : memref<128x36xbf16, #tpu.memory_space<vmem>>, vector<128x4xbf16>,
    %c2_i32 = arith.constant 2 : i32
    %27 = arith.addi %0, %c2_i32 : i32
    %c0_12 = arith.constant 0 : index
    %28 = arith.index_cast %27 : i32 to index
    %c0_13 = arith.constant 0 : index
    %c0_14 = arith.constant 0 : index
    %29 = vector.load %arg2[%c0_12, %28, %c0_13, %c0_14] : memref<1x18x18x4xbf16, #tpu.memory_space<vmem>>, vector<1x8x18x4xbf16>
    %30 = vector.shape_cast %29 : vector<1x8x18x4xbf16> to vector<8x18x4xbf16>
    %31 = vector.extract_strided_slice %30 {offsets = [0, 0, 0], sizes = [8, 16, 4], strides = [1, 1, 1]} : vector<8x18x4xbf16> to vector<8x16x4xbf16>
    %32 = vector.shape_cast %31 : vector<8x16x4xbf16> to vector<128x4xbf16>
    %c0_15 = arith.constant 0 : index
    %c24 = arith.constant 24 : index
    %33 = vector.load %arg7[%c0_15, %c24] : memref<128x36xbf16, #tpu.memory_space<vmem>>, vector<128x4xbf16>
    tpu.vector_store %arg7[%c0_15, %c24], %32 {strides = array<i32>} : memref<128x36xbf16, #tpu.memory_space<vmem>>, vector<128x4xbf16>,
    %34 = vector.extract_strided_slice %30 {offsets = [0, 1, 0], sizes = [8, 16, 4], strides = [1, 1, 1]} : vector<8x18x4xbf16> to vector<8x16x4xbf16>
    %35 = vector.shape_cast %34 : vector<8x16x4xbf16> to vector<128x4xbf16>
    %c0_16 = arith.constant 0 : index
    %c28 = arith.constant 28 : index
    %36 = vector.load %arg7[%c0_16, %c28] : memref<128x36xbf16, #tpu.memory_space<vmem>>, vector<128x4xbf16>
    tpu.vector_store %arg7[%c0_16, %c28], %35 {strides = array<i32>} : memref<128x36xbf16, #tpu.memory_space<vmem>>, vector<128x4xbf16>,
    %37 = vector.extract_strided_slice %30 {offsets = [0, 2, 0], sizes = [8, 16, 4], strides = [1, 1, 1]} : vector<8x18x4xbf16> to vector<8x16x4xbf16>
    %38 = vector.shape_cast %37 : vector<8x16x4xbf16> to vector<128x4xbf16>
    %c0_17 = arith.constant 0 : index
    %c32 = arith.constant 32 : index
    %39 = vector.load %arg7[%c0_17, %c32] : memref<128x36xbf16, #tpu.memory_space<vmem>>, vector<128x4xbf16>
    tpu.vector_store %arg7[%c0_17, %c32], %38 {strides = array<i32>} : memref<128x36xbf16, #tpu.memory_space<vmem>>, vector<128x4xbf16>,
    %c0_18 = arith.constant 0 : index
    %c0_19 = arith.constant 0 : index
    %40 = vector.load %arg7[%c0_18, %c0_19] : memref<128x36xbf16, #tpu.memory_space<vmem>>, vector<128x36xbf16>
    %c0_20 = arith.constant 0 : index
    %c0_21 = arith.constant 0 : index
    %41 = vector.load %arg3[%c0_20, %c0_21] : memref<36x128xbf16, #tpu.memory_space<vmem>>, vector<36x128xbf16>
    %cst = arith.constant dense<0.000000e+00> : vector<128x128xf32>
    %42 = tpu.matmul %40, %41, %cst {dimension_numbers = #tpu.dot_dimension_numbers<[1], [0], [0], [1], [0, 0, 1, 1], [], []>} : vector<128x36xbf16>, vector<36x128xbf16>, vector<128x128xf32> -> vector<128x128xf32>
    %c0_22 = arith.constant 0 : index
    %c0_23 = arith.constant 0 : index
    %43 = vector.load %arg4[%c0_22, %c0_23] : memref<1x128xf32, #tpu.memory_space<vmem>>, vector<1x128xf32>
    %44 = vector.broadcast %43 : vector<1x128xf32> to vector<128x128xf32>
    %45 = arith.mulf %42, %44 : vector<128x128xf32>
    %c0_24 = arith.constant 0 : index
    %c0_25 = arith.constant 0 : index
    %46 = vector.load %arg5[%c0_24, %c0_25] : memref<1x128xf32, #tpu.memory_space<vmem>>, vector<1x128xf32>
    %47 = vector.broadcast %46 : vector<1x128xf32> to vector<128x128xf32>
    %48 = arith.addf %45, %47 : vector<128x128xf32>
    %cst_26 = arith.constant 0.000000e+00 : f32
    %49 = vector.broadcast %cst_26 : f32 to vector<128x128xf32>
    %50 = arith.maximumf %48, %49 : vector<128x128xf32>
    %51 = vector.shape_cast %50 : vector<128x128xf32> to vector<8x16x128xf32>
    %c0_27 = arith.constant 0 : index
    %c0_28 = arith.constant 0 : index
    %c0_29 = arith.constant 0 : index
    %c0_30 = arith.constant 0 : index
    %52 = vector.load %arg6[%c0_27, %c0_28, %c0_29, %c0_30] : memref<1x8x16x128xf32, #tpu.memory_space<vmem>>, vector<1x8x16x128xf32>
    %53 = vector.shape_cast %52 : vector<1x8x16x128xf32> to vector<8x16x128xf32>
    %54 = vector.shape_cast %51 : vector<8x16x128xf32> to vector<1x8x16x128xf32>
    tpu.vector_store %arg6[%c0_27, %c0_28, %c0_29, %c0_30], %54 {strides = array<i32>} : memref<1x8x16x128xf32, #tpu.memory_space<vmem>>, vector<1x8x16x128xf32>,
    return
  }
  func.func @transform_0(%arg0: i32, %arg1: i32) -> (i32, i32, i32, i32) {
    %c0_i32 = arith.constant 0 : i32
    %c0_i32_0 = arith.constant 0 : i32
    %c0_i32_1 = arith.constant 0 : i32
    %c0_i32_2 = arith.constant 0 : i32
    return %arg0, %c0_i32, %c0_i32_0, %c0_i32_1 : i32, i32, i32, i32
  }
  func.func @transform_1(%arg0: i32, %arg1: i32) -> (i32, i32) {
    %c0_i32 = arith.constant 0 : i32
    %c0_i32_0 = arith.constant 0 : i32
    %c0_i32_1 = arith.constant 0 : i32
    return %c0_i32, %c0_i32_0 : i32, i32
  }
  func.func @transform_2(%arg0: i32, %arg1: i32) -> (i32, i32) {
    %c0_i32 = arith.constant 0 : i32
    %c0_i32_0 = arith.constant 0 : i32
    %c0_i32_1 = arith.constant 0 : i32
    return %c0_i32, %c0_i32_0 : i32, i32
  }
  func.func @transform_3(%arg0: i32, %arg1: i32) -> (i32, i32) {
    %c0_i32 = arith.constant 0 : i32
    %c0_i32_0 = arith.constant 0 : i32
    %c0_i32_1 = arith.constant 0 : i32
    return %c0_i32, %c0_i32_0 : i32, i32
  }
  func.func @transform_4(%arg0: i32, %arg1: i32) -> (i32, i32, i32, i32) {
    %c0_i32 = arith.constant 0 : i32
    %c0_i32_0 = arith.constant 0 : i32
    %c0_i32_1 = arith.constant 0 : i32
    return %arg0, %arg1, %c0_i32, %c0_i32_0 : i32, i32, i32, i32
  }
}

</mosaic_0001>

<bundles_post_ra>
// kernel: tpu_custom_call.1
= control target key start
LH: loop header
LB: loop body
LE: loop exit
PB: predicated region body
PF: predicated region fallthrough
CT: control target
= control target key end

     0   :  { %9 = vsyncpa [#allocation4], 0  ;;  %s3474_s0 = inlined_call_operand.vmem [shape: bf16[2,18,18,4], index: 0, kind: input, shape index: {}]   ;;  %s3475_s1 = inlined_call_operand.vmem [shape: bf16[36,128], index: 1, kind: input, shape index: {}]   ;;  %s3476_s2 = inlined_call_operand.vmem [shape: f32[1,128], index: 2, kind: input, shape index: {}]   ;;  %s3477_s3 = inlined_call_operand.vmem [shape: f32[1,128], index: 3, kind: input, shape index: {}]   ;;  %s3478_s4 = inlined_call_operand.hbm [shape: f32[2,16,16,128], index: 4, kind: output, shape index: {}]  }
   0x1   :  { %11 = vsyncpa [#allocation4 + $0x1], 0  ;;  %s2366_s15 = smov 0   ;;  %s2368_s16 = smov 0  }
   0x2   :  { %s2370_s17 = smov 0   ;;  %s2372_s18 = smov 0  }
   0x3   :  { %s2374_s19 = smov 0   ;;  %s2376_s20 = smov 0  }
   0x4   :  { %s2378_s21 = smov 0   ;;  %s2380_s22 = smov 0  }
   0x5 LB: > { %s1986_s23 = sadd.s32 4294967295, %s2330_s22   ;;  %s1987_s24 = sadd.s32 4294967294, %s2330_s22   ;;  %s2330_s22 = sphi %s2380_s22, %s17_s22   ;;  %s2326_s21 = sphi %s2378_s21, %s3491_s21   ;;  %s2322_s20 = sphi %s2376_s20, %s3490_s20   ;;  %s2318_s19 = sphi %s2374_s19, %s3489_s19   ;;  %s2314_s18 = sphi %s2372_s18, %s3488_s18   ;;  %s2310_s17 = sphi %s2370_s17, %s3487_s17   ;;  %s2306_s16 = sphi %s2368_s16, %s3486_s16   ;;  %s2302_s15 = sphi %s2366_s15, %s3485_s15  }
   0x6   : > { %s26_s25 = sadd.s32 1, %s2322_s20  ;;  %s29_s26 = sadd.s32 1, %s2326_s21 }
   0x7   : > { %p27_p0 = scmp.ge.s32.totalorder %s26_s25, 2  ;;  %p137_p1 = scmp.ne.s32.totalorder %s2310_s17, %s2306_s16 }
   0x8   : > { %p138_p2 = scmp.eq.s32.totalorder %s1986_s23, 3  ;;  %p143_p5 = scmp.ne.s32.totalorder %s2306_s16, %s2302_s15 }
   0x9   : > { %s3493_s25 = smov (%p27_p0, %s26_s25), 0  ;;  %s3495_s26 = smov (!%p27_p0, %s29_s26), %s2326_s21 }
   0xa   : > { %s123_s27 = ssub.s32 %s2322_s20, %s3493_s25  ;;  %p2417_p3 = por %p138_p2, %p137_p1 }
   0xb   : > { %p31_p4 = scmp.ge.s32.totalorder %s3495_s26, 2  ;;  %p144_p6 = scmp.eq.s32.totalorder %s1987_s24, 3 }
   0xc   : > { %p1990_p7 = scmp.ge.s32.totalorder %s2330_s22, 1  ;;  %p179_p9 = scmp.lt.s32.totalorder %s2330_s22, 5 }
   0xd   : > { %s3497_s26 = smov (%p31_p4, %s3495_s26), 0  ;;  %p2426_p8 = por %p144_p6, %p143_p5 }
   0xe   : > { %s122_s30 = ssub.s32 %s2326_s21, %s3497_s26  ;;  %s127_s5 = sadd.s32 1, %s2310_s17 }
   0xf   : > { %s124_s6 = sor.u32 %s123_s27, %s122_s30  ;;  %p180_p10 = pnand %p1990_p7, %p179_p9 }
  0x10   : > { %p125_p11 = scmp.eq.s32.totalorder %s124_s6, 0  ;;  %p205_p12 = scmp.lt.s32.totalorder (!%p180_p10), %s2318_s19, 1 }
  0x11   : > { %183 = sbr.rel (%p180_p10) target bundleno = 642 (0x282), region = 36  ;;  %s2332_s23 = smov (!%p180_p10), 4  }
  0x12   : > { %s2435_s7 = scalar_select %p125_p11, %s2310_s17, %s127_s5  }
  0x13   : > { %s2127_s9 = smul.u32 (!%p180_p10), 96, %s2314_s18  ;;  %s2333_s24 = smov (!%p180_p10), 8  }
  0x14   : > { %s2334_s27 = smov (!%p180_p10), 12   ;;  %s2335_s30 = smov (!%p180_p10), 16  }
  0x15   : > { %s2336_s5 = smov (!%p180_p10), 20   ;;  %s2337_s6 = smov (!%p180_p10), 24  }
  0x16   : > { %s206_s8 = scalar_select %p205_p12, %s2318_s19, 1  ;;  %vm257_vm0 = vsmask.f32 3328  ;;  %vm258_vm1 = vsmask.f32 7440  ;;  %vm541_vm3 = vcmask 1042432  }
  0x17   : > { %vm2478_vm2 = vmor %vm257_vm0, %vm258_vm1  ;;  %vm542_vm4 = vcmask 1046532   ;;  %vm240_vm6 = vcmask 27648   ;;  %vm500_vm7 = vcmask 60448   ;;  %vm648_vm8 = vcmask 93248   ;;  %s2138_s11 = sshll.u32 %s2314_s18, 4  ;;  %s2123_s12 = sshll.u32 %s2318_s19, 5 }
  0x18   : > { %s2148_s10 = smul.u32 216, %s206_s8  ;;  %vm2610_vm5 = vmor %vm541_vm3, %vm542_vm4  ;;  %vm757_vm9 = vcmask 126048   ;;  %s2338_s8 = smov 28   ;;  %vm1014_vm10 = vcmask 158848   ;;  %vm1143_vm11 = vcmask 191648   ;;  %vm1756_vm12 = vcmask 1041408  }
  0x19   : > { %vm1252_vm13 = vcmask 224448   ;;  %vm1509_vm14 = vcmask 257248   ;;  %vm1638_vm15 = vcmask 290048   ;;  %vm1731_vm0 = vcmask 293888  }
  0x1a   : > { %s209_s13 = scalar_lea.vmem %s3474_s0, %s2148_s10 }
  0x1b   : > { %s2443_s14 = scalar_lea.vmem %s209_s13, %s2127_s9  ;;  %s2339_s9 = smov 32  }
  0x1c   : > { %v2446_v0 = vld [vmem:[%s2443_s14 + $0xc] sm:$0xf]  ;;  %v2449_v1 = vld [vmem:[%s2443_s14 + $0x10] sm:$0xf]  ;;  %v2452_v2 = vld [vmem:[%s2443_s14] sm:$0xf]  ;;  %s1894_s13 = sadd.s32 %s2138_s11, %s2123_s12 }
  0x1d   : > { %v285_v3 = vshrl.u32 %v2446_v0, 16  ;;  %v288_v4 = vshll.u32 %v2446_v0, 16  ;;  %v294_v5 = vshll.u32 %v2449_v1, 16  ;;  %v2458_v6 = vld [vmem:[%s2443_s14 + $0x4] sm:$0xf]  ;;  %v261_v7 = vshrl.u32 %v2452_v2, 16 }
  0x1e   : > { %v264_v8 = vshll.u32 %v2452_v2, 16  ;;  %v270_v9 = vshll.u32 %v2458_v6, 16  ;;  %v2464_v10 = vld [vmem:[%s2443_s14 + $0x14] sm:$0x1]  ;;  %v298_v11 = vshrl.u32 %v2449_v1, 16  ;;  %v274_v12 = vshrl.u32 %v2458_v6, 16 }
  0x1f   : > { %v287_v13 = vrot.slane %v285_v3, 4  ;;  %v290_v14 = vrot.slane %v288_v4, 5  ;;  %v263_v15 = vrot.slane %v261_v7, 4  ;;  %v2469_v16 = vld [vmem:[%s2443_s14 + $0x8] sm:$0x1]  ;;  %v296_v17 = vrot.slane %v294_v5, 5 }
  0x20   : > { %v266_v18 = vrot.slane %v264_v8, 5  ;;  %v272_v19 = vrot.slane %v270_v9, 5  ;;  %v300_v20 = vrot.slane %v298_v11, 4  ;;  %v2472_v21 = vld [vmem:[%s2443_s14 + $0x28] sm:$0xf]  ;;  %v304_v23 = vshll.u32 %v2464_v10, 16 }
  0x21   : > { %v291_v22 = vor.u32 %v290_v14, %v287_v13  ;;  %v276_v24 = vrot.slane %v274_v12, 4  ;;  %v342_v25 = vshll.u32 %v2472_v21, 16  ;;  %v280_v29 = vshll.u32 %v2469_v16, 16  ;;  %v2485_v31 = vld [vmem:[%s2443_s14 + $0x24] sm:$0xf] }
  0x22   : > { %v267_v27 = vor.u32 %v266_v18, %v263_v15  ;;  %v301_v28 = vor.u32 %v300_v20, %v296_v17  ;;  %v346_v30 = vshrl.u32 %v2472_v21, 16  ;;  %v2488_v35 = vld [vmem:[%s2443_s14 + $0x2c] sm:$0x1]  ;;  %v2493_v37 = vld [vmem:[%s2443_s14 + $0x18] sm:$0xf]  ;;  %v333_v40 = vshrl.u32 %v2485_v31, 16 }
  0x23   : > { %v292_v32 = vrot.slane %v291_v22, 4  ;;  %v277_v33 = vor.u32 %v276_v24, %v272_v19  ;;  %v2490_v36 = vrot.slane %v342_v25, 5  ;;  %v336_v41 = vshll.u32 %v2485_v31, 16  ;;  %v2500_v42 = vld [vmem:[%s2443_s14 + $0x1c] sm:$0xf] }
  0x24   : > { %v268_v34 = vrot.slane %v267_v27, 4  ;;  %v348_v39 = vrot.slane %v346_v30, 4  ;;  %v302_v44 = vrot.slane %v301_v28, 4  ;;  %v306_v45 = vrot.slane %v304_v23, 5  ;;  %v2506_v47 = vld [vmem:[%s2443_s14 + $0x3c] sm:$0xf] }
  0x25   : > { %v297_v38 = vsel %vm2478_vm2, %v292_v32, %v296_v17  ;;  %v282_v46 = vrot.slane %v280_v29, 5  ;;  %v278_v48 = vrot.slane %v277_v33, 4  ;;  %v335_v49 = vrot.slane %v333_v40, 4  ;;  %v2516_v58 = vld [vmem:[%s2443_s14 + $0x34] sm:$0xf] }
  0x26   : > { %456 = vrot.lane.b32.xlu1 %v297_v38, %s2332_s23  ;;  %v273_v43 = vsel %vm2478_vm2, %v268_v34, %v272_v19  ;;  %v338_v50 = vrot.slane %v336_v41, 5  ;;  %v309_v51 = vshrl.u32 %v2493_v37, 16  ;;  %v312_v52 = vshll.u32 %v2493_v37, 16  ;;  %v2524_v4 = vld [vmem:[%s2443_s14 + $0x20] sm:$0x1] }
  0x27   : > { %452 = vrot.lane.b32.xlu0 %v273_v43, %s2332_s23  ;;  %v318_v53 = vshll.u32 %v2500_v42, 16  ;;  %v349_v54 = vor.u32 %v348_v39, %v2490_v36  ;;  %v352_v55 = vshll.u32 %v2488_v35, 16  ;;  %v381_v57 = vshrl.u32 %v2506_v47, 16  ;;  %v2531_v15 = vld [vmem:[%s2443_s14 + $0x40] sm:$0xf] }
  0x28   : > { %v311_v56 = vrot.slane %v309_v51, 4  ;;  %v314_v59 = vrot.slane %v312_v52, 5  ;;  %v384_v60 = vshll.u32 %v2506_v47, 16  ;;  %v307_v61 = vsel %vm2478_vm2, %v302_v44, %v306_v45  ;;  %v2536_v22 = vld [vmem:[%s2443_s14 + $0x38] sm:$0x1] }
  0x29   : > { %v283_v62 = vsel %vm2478_vm2, %v278_v48, %v282_v46  ;;  %v339_v63 = vor.u32 %v338_v50, %v335_v49  ;;  %v320_v3 = vrot.slane %v318_v53, 5  ;;  %v366_v7 = vshll.u32 %v2516_v58, 16  ;;  %v2541_v28 = vld [vmem:[%s2443_s14 + $0x4c] sm:$0xf]  ;;  %v2544_v29 = vld [vmem:[%s2443_s14 + $0x30] sm:$0xf] }
  0x2a   : > { %v315_v5 = vor.u32 %v314_v59, %v311_v56  ;;  %v370_v8 = vshrl.u32 %v2516_v58, 16  ;;  %v322_v9 = vshrl.u32 %v2500_v42, 16  ;;  %v350_v11 = vrot.slane %v349_v54, 4  ;;  %v2551_v33 = vld [vmem:[%s2443_s14 + $0x48] sm:$0xf] }
  0x2b   : > { %v354_v12 = vrot.slane %v352_v55, 5  ;;  %v383_v13 = vrot.slane %v381_v57, 4  ;;  %v386_v17 = vrot.slane %v384_v60, 5  ;;  %v328_v19 = vshll.u32 %v2524_v4, 16  ;;  %245 = vst.msk [vmem:[#allocation2 + $0x10] sm:$0xf] %vm240_vm6, %v2493_v37 }
  0x2c   : > { %v316_v14 = vrot.slane %v315_v5, 4  ;;  %v324_v18 = vrot.slane %v322_v9, 4  ;;  %v340_v20 = vrot.slane %v339_v63, 4  ;;  %v368_v24 = vrot.slane %v366_v7, 5  ;;  %v2573_v5 = vld [vmem:[%s2443_s14 + $0x58] sm:$0xf] }
  0x2d   : > { %v372_v25 = vrot.slane %v370_v8, 4  ;;  %v355_v30 = vsel %vm2478_vm2, %v350_v11, %v354_v12  ;;  %v390_v32 = vshll.u32 %v2531_v15, 16  ;;  %v387_v34 = vor.u32 %v386_v17, %v383_v13  ;;  %v2576_v8 = vld [vmem:[%s2443_s14 + $0x44] sm:$0x1]  ;;  %241 = vst.msk [vmem:[#allocation2] sm:$0xf] %vm240_vm6, %v2452_v2 }
  0x2e   : > { %458 = vrot.lane.b32.xlu1 %v307_v61, %s2332_s23  ;;  %v321_v23 = vsel %vm2478_vm2, %v316_v14, %v320_v3  ;;  %v325_v27 = vor.u32 %v324_v18, %v320_v3  ;;  %v376_v38 = vshll.u32 %v2536_v22, 16  ;;  %v330_v40 = vrot.slane %v328_v19, 5  ;;  %v2568_v61 = vld [vmem:[%s2443_s14 + $0x50] sm:$0x1]  ;;  %v2582_v14 = vld [vmem:[%s2443_s14 + $0x54] sm:$0xf] }
  0x2f   : > { %454 = vrot.lane.b32.xlu0 %v283_v62, %s2332_s23  ;;  %460 = vrot.lane.b32.xlu2 %v321_v23, %s2332_s23  ;;  %v414_v41 = vshll.u32 %v2541_v28, 16  ;;  %v418_v43 = vshrl.u32 %v2541_v28, 16  ;;  %v357_v44 = vshrl.u32 %v2544_v29, 16  ;;  %v360_v45 = vshll.u32 %v2544_v29, 16  ;;  %242 = vst.msk [vmem:[#allocation2 + $0x4] sm:$0xf] %vm240_vm6, %v2458_v6 }
  0x30   : > { %v326_v39 = vrot.slane %v325_v27, 4  ;;  %v345_v46 = vsel %vm2478_vm2, %v340_v20, %v2490_v36  ;;  %v373_v48 = vor.u32 %v372_v25, %v368_v24  ;;  %v405_v49 = vshrl.u32 %v2551_v33, 16  ;;  %243 = vst.msk [vmem:[#allocation2 + $0x8] sm:$0xf] %vm240_vm6, %v2446_v0 }
  0x31   : > { %v408_v50 = vshll.u32 %v2551_v33, 16  ;;  %v359_v51 = vrot.slane %v357_v44, 4  ;;  %v362_v52 = vrot.slane %v360_v45, 5  ;;  %v392_v53 = vrot.slane %v390_v32, 5  ;;  %244 = vst.msk [vmem:[#allocation2 + $0xc] sm:$0xf] %vm240_vm6, %v2449_v1 }
  0x32   : > { %v378_v54 = vrot.slane %v376_v38, 5  ;;  %v331_v55 = vsel %vm2478_vm2, %v326_v39, %v330_v40  ;;  %v388_v36 = vrot.slane %v387_v34, 4  ;;  %v416_v56 = vrot.slane %v414_v41, 5  ;;  %246 = vst.msk [vmem:[#allocation2 + $0x14] sm:$0xf] %vm240_vm6, %v2500_v42 }
  0x33   : > { %v420_v57 = vrot.slane %v418_v43, 4  ;;  %v363_v59 = vor.u32 %v362_v52, %v359_v51  ;;  %v374_v60 = vrot.slane %v373_v48, 4  ;;  %v407_v62 = vrot.slane %v405_v49, 4  ;;  %v2597_v43 = vld [vmem:[%s2443_s14 + $0x5c] sm:$0x1] }
  0x34   : > { %v410_v63 = vrot.slane %v408_v50, 5  ;;  %v394_v3 = vshrl.u32 %v2531_v15, 16  ;;  %v393_v11 = vsel %vm2478_vm2, %v388_v36, %v392_v53  ;;  %v424_v13 = vshll.u32 %v2568_v61, 16  ;;  %247 = vst.msk [vmem:[#allocation2 + $0x18] sm:$0xf] %vm240_vm6, %v2485_v31 }
  0x35   : > { %v364_v7 = vrot.slane %v363_v59, 4  ;;  %v421_v12 = vor.u32 %v420_v57, %v416_v56  ;;  %v379_v17 = vsel %vm2478_vm2, %v374_v60, %v378_v54  ;;  %v438_v19 = vshll.u32 %v2573_v5, 16  ;;  %248 = vst.msk [vmem:[#allocation2 + $0x1c] sm:$0xf] %vm240_vm6, %v2472_v21 }
  0x36   : > { %466 = vrot.lane.b32.xlu1 %v355_v30, %s2332_s23  ;;  %v396_v9 = vrot.slane %v394_v3, 4  ;;  %v411_v18 = vor.u32 %v410_v63, %v407_v62  ;;  %v442_v20 = vshrl.u32 %v2573_v5, 16  ;;  %v400_v23 = vshll.u32 %v2576_v8, 16  ;;  %249 = vst.msk [vmem:[#allocation2 + $0x20] sm:$0xf] %vm240_vm6, %v2544_v29 }
  0x37   : > { %464 = vrot.lane.b32.xlu0 %v345_v46, %s2332_s23  ;;  %462 = vrot.lane.b32.xlu2 %v331_v55, %s2332_s23  ;;  %v369_v25 = vsel %vm2478_vm2, %v364_v7, %v368_v24  ;;  %v429_v30 = vshrl.u32 %v2582_v14, 16  ;;  %v432_v32 = vshll.u32 %v2582_v14, 16  ;;  %v422_v34 = vrot.slane %v421_v12, 4  ;;  %250 = vst.msk [vmem:[#allocation2 + $0x24] sm:$0xf] %vm240_vm6, %v2516_v58 }
  0x38   : > { %v397_v27 = vor.u32 %v396_v9, %v392_v53  ;;  %v426_v38 = vrot.slane %v424_v13, 5  ;;  %v412_v39 = vrot.slane %v411_v18, 4  ;;  %v440_v40 = vrot.slane %v438_v19, 5  ;;  %251 = vst.msk [vmem:[#allocation2 + $0x28] sm:$0xf] %vm240_vm6, %v2506_v47 }
  0x39   : > { %v444_v41 = vrot.slane %v442_v20, 4  ;;  %v402_v45 = vrot.slane %v400_v23, 5  ;;  %v431_v46 = vrot.slane %v429_v30, 4  ;;  %v434_v24 = vrot.slane %v432_v32, 5  ;;  %252 = vst.msk [vmem:[#allocation2 + $0x2c] sm:$0xf] %vm240_vm6, %v2531_v15 }
  0x3a   : > { %v398_v44 = vrot.slane %v397_v27, 4  ;;  %v427_v48 = vsel %vm2478_vm2, %v422_v34, %v426_v38  ;;  %v417_v49 = vsel %vm2478_vm2, %v412_v39, %v416_v56  ;;  %v448_v51 = vshll.u32 %v2597_v43, 16  ;;  %253 = vst.msk [vmem:[#allocation2 + $0x30] sm:$0xf] %vm240_vm6, %v2551_v33 }
  0x3b   : > { %v445_v50 = vor.u32 %v444_v41, %v440_v40  ;;  %v435_v53 = vor.u32 %v434_v24, %v431_v46  ;;  %v1996_v54 = vrot.slane %v2452_v2, 9  ;;  %v546_v55 = vrot.slane %v2458_v6, 5  ;;  %v2712_v2 = vld [vmem:[%s2443_s14 + $0xc] sm:$0xf]  ;;  %254 = vst.msk [vmem:[#allocation2 + $0x34] sm:$0xf] %vm240_vm6, %v2541_v28 }
  0x3c   : > { %v403_v52 = vsel %vm2478_vm2, %v398_v44, %v402_v45  ;;  %v450_v57 = vrot.slane %v448_v51, 5  ;;  %v553_v62 = vrot.slane %v2449_v1, 5  ;;  %v556_v9 = vrot.slane %v2464_v10, 5  ;;  %v2734_v1 = vld [vmem:[%s2443_s14 + $0x24] sm:$0xf] }
  0x3d   : > { %v446_v56 = vrot.slane %v445_v50, 4  ;;  %v436_v59 = vrot.slane %v435_v53, 4  ;;  %v547_v60 = vsel %vm2610_vm5, %v1996_v54, %v546_v55  ;;  %v548_v12 = vrot.slane %v546_v55, 4  ;;  %v2010_v6 = vld [vmem:[%s2443_s14 + $0x1c] sm:$0xf] }
  0x3e   : > { %472 = vrot.lane.b32.xlu1 %v393_v11, %s2332_s23  ;;  %v555_v7 = vrot.slane %v553_v62, 4  ;;  %v1997_v11 = vrot.slane %v2446_v0, 9  ;;  %v549_v13 = vrot.slane %v2469_v16, 5  ;;  %v560_v19 = vrot.slane %v2500_v42, 5  ;;  %v2729_v0 = vld [vmem:[%s2443_s14 + $0x28] sm:$0xf] }
  0x3f   : > { %470 = vrot.lane.b32.xlu0 %v379_v17, %s2332_s23  ;;  %468 = vrot.lane.b32.xlu2 %v369_v25, %s2332_s23  ;;  %v451_v63 = vsel %vm2478_vm2, %v446_v56, %v450_v57  ;;  %v441_v3 = vsel %vm2478_vm2, %v436_v59, %v440_v40  ;;  %v1999_v20 = vrot.slane %v2485_v31, 9  ;;  %v567_v23 = vrot.slane %v2472_v21, 5  ;;  %255 = vst.msk [vmem:[#allocation2 + $0x38] sm:$0xf] %vm240_vm6, %v2582_v14  ;;  %v2751_v21 = vld [vmem:[%s2443_s14 + $0x3c] sm:$0xf] }
  0x40   : > { %v557_v17 = vsel %vm2610_vm5, %v555_v7, %v556_v9  ;;  %v554_v18 = vsel %vm2610_vm5, %v1997_v11, %v553_v62  ;;  %v550_v10 = vsel %vm2610_vm5, %v548_v12, %v549_v13  ;;  %v562_v16 = vrot.slane %v560_v19, 4  ;;  %256 = vst.msk [vmem:[#allocation2 + $0x3c] sm:$0xf] %vm240_vm6, %v2573_v5  ;;  %v2760_v42 = vld [vmem:[%s2443_s14 + $0x30] sm:$0xf] }
  0x41   : > { %v563_v25 = vrot.slane %v2524_v4, 5  ;;  %v1998_v27 = vrot.slane %v2493_v37, 9  ;;  %v568_v30 = vsel %vm2610_vm5, %v1999_v20, %v567_v23  ;;  %v574_v32 = vrot.slane %v2516_v58, 5  ;;  %v2754_v37 = vld [vmem:[%s2443_s14 + $0x34] sm:$0xf] }
  0x42   : > { %v577_v39 = vrot.slane %v2536_v22, 5  ;;  %v2000_v40 = vrot.slane %v2544_v29, 9  ;;  %v569_v41 = vrot.slane %v567_v23, 4  ;;  %v570_v44 = vrot.slane %v2488_v35, 5  ;;  %v2794_v20 = vld [vmem:[%s2443_s14 + $0x60] sm:$0xf] }
  0x43   : > { %v564_v34 = vsel %vm2610_vm5, %v562_v16, %v563_v25  ;;  %v561_v38 = vsel %vm2610_vm5, %v1998_v27, %v560_v19  ;;  %v576_v4 = vrot.slane %v574_v32, 4  ;;  %v581_v24 = vrot.slane %v2531_v15, 5  ;;  %v2769_v15 = vld [vmem:[%s2443_s14 + $0x4c] sm:$0xf] }
  0x44   : > { %v575_v46 = vsel %vm2610_vm5, %v2000_v40, %v574_v32  ;;  %v571_v22 = vsel %vm2610_vm5, %v569_v41, %v570_v44  ;;  %v584_v50 = vrot.slane %v2576_v8, 5  ;;  %v2001_v51 = vrot.slane %v2506_v47, 9  ;;  %v2798_v32 = vld [vmem:[%s2443_s14 + $0x58] sm:$0xf] }
  0x45   : > { %v578_v45 = vsel %vm2610_vm5, %v576_v4, %v577_v39  ;;  %v583_v35 = vrot.slane %v581_v24, 4  ;;  %v595_v53 = vrot.slane %v2573_v5, 5  ;;  %v598_v56 = vrot.slane %v2597_v43, 5  ;;  %v2774_v5 = vld [vmem:[%s2443_s14 + $0x48] sm:$0xf] }
  0x46   : > { %478 = vrot.lane.b32.xlu1 %v427_v48, %s2332_s23  ;;  %v2002_v48 = vrot.slane %v2551_v33, 9  ;;  %v582_v55 = vsel %vm2610_vm5, %v2001_v51, %v581_v24  ;;  %v2003_v57 = vrot.slane %v2582_v14, 9  ;;  %v775_v29 = vshrl.u32 %v2712_v2, 16  ;;  %v2780_v14 = vld [vmem:[%s2443_s14 + $0x40] sm:$0xf] }
  0x47   : > { %476 = vrot.lane.b32.xlu0 %v417_v49, %s2332_s23  ;;  %474 = vrot.lane.b32.xlu2 %v403_v52, %s2332_s23  ;;  %v588_v49 = vrot.slane %v2541_v28, 5  ;;  %v585_v54 = vsel %vm2610_vm5, %v583_v35, %v584_v50  ;;  %v597_v8 = vrot.slane %v595_v53, 4  ;;  %v778_v33 = vshll.u32 %v2712_v2, 16  ;;  %v2806_v39 = vld [vmem:[%s2443_s14 + $0x54] sm:$0xf] }
  0x48   : > { %v777_v11 = vrot.slane %v775_v29, 4  ;;  %v823_v19 = vshrl.u32 %v2734_v1, 16  ;;  %v808_v27 = vshll.u32 %v2010_v6, 16  ;;  %v2011_v35 = vld [vmem:[%s2443_s14 + $0x20] sm:$0x1] }
  0x49   : > { %v589_v52 = vsel %vm2610_vm5, %v2002_v48, %v588_v49  ;;  %v590_v59 = vrot.slane %v588_v49, 4  ;;  %v599_v62 = vsel %vm2610_vm5, %v597_v8, %v598_v56  ;;  %v780_v12 = vrot.slane %v778_v33, 5 }
  0x4a   : > { %v825_v40 = vrot.slane %v823_v19, 4  ;;  %v832_v56 = vshll.u32 %v2729_v0, 16  ;;  %v922_v19 = vshll.u32 %v2806_v39, 16 }
  0x4e   : > { %600 = vrot.lane.b32.xlu1 %v547_v60, %s2333_s24  ;;  %v591_v60 = vrot.slane %v2568_v61, 5  ;;  %v2698_v61 = vld [vmem:[%s2443_s14 + $0x18] sm:$0xf] }
  0x4f   : > { %482 = vrot.lane.b32.xlu0 %v451_v63, %s2332_s23  ;;  %480 = vrot.lane.b32.xlu2 %v441_v3, %s2332_s23  ;;  %v596_v63 = vsel %vm2610_vm5, %v2003_v57, %v595_v53  ;;  %v2703_v3 = vld [vmem:[%s2443_s14 + $0x10] sm:$0xf]  ;;  %v802_v4 = vshll.u32 %v2698_v61, 16  ;;  %v860_v53 = vshrl.u32 %v2754_v37, 16  ;;  %s2124_s23 = sshll.u32 %s1894_s13, 3  ;;  %s2256_s13 = scalar_lea.hbm %s3478_s4, 512 }
  0x50   : > { %v592_v43 = vsel %vm2610_vm5, %v590_v59, %v591_v60  ;;  %v784_v47 = vshll.u32 %v2703_v3, 16  ;;  %v788_v58 = vshrl.u32 %v2703_v3, 16  ;;  %v850_v59 = vshll.u32 %v2760_v42, 16 }
  0x51   : > { %v804_v51 = vrot.slane %v802_v4, 5 }
  0x52   : > { %v786_v7 = vrot.slane %v784_v47, 5  ;;  %v790_v9 = vrot.slane %v788_v58, 4  ;;  %v834_v47 = vrot.slane %v832_v56, 5 }
  0x54   : > { %v791_v23 = vor.u32 %v790_v9, %v786_v7  ;;  %v2837_v9 = vld [vmem:[%s2443_s14 + $0x38] sm:$0x1] }
  0x56   : > { %606 = vrot.lane.b32.xlu1 %v557_v17, %s2333_s24  ;;  %v2785_v17 = vld [vmem:[%s2443_s14 + $0x14] sm:$0x1]  ;;  %v792_v44 = vrot.slane %v791_v23, 4 }
  0x57   : > { %604 = vrot.lane.b32.xlu0 %v554_v18, %s2333_s24  ;;  %602 = vrot.lane.b32.xlu2 %v550_v10, %s2333_s24  ;;  %v826_v10 = vshll.u32 %v2734_v1, 16  ;;  %v794_v16 = vshll.u32 %v2785_v17, 16 }
  0x59   : > { %v828_v41 = vrot.slane %v826_v10, 5 }
  0x5b   : > { %v829_v8 = vor.u32 %v828_v41, %v825_v40  ;;  %v871_v40 = vshrl.u32 %v2751_v21, 16  ;;  %v874_v41 = vshll.u32 %v2751_v21, 16 }
  0x5e   : > { %612 = vrot.lane.b32.xlu1 %v568_v30, %s2333_s24  ;;  %v812_v30 = vshrl.u32 %v2010_v6, 16 }
  0x5f   : > { %610 = vrot.lane.b32.xlu0 %v564_v34, %s2333_s24  ;;  %608 = vrot.lane.b32.xlu2 %v561_v38, %s2333_s24  ;;  %v781_v34 = vor.u32 %v780_v12, %v777_v11  ;;  %v799_v38 = vshrl.u32 %v2698_v61, 16 }
  0x60   : > { %v814_v24 = vrot.slane %v812_v30, 4  ;;  %v880_v30 = vshll.u32 %v2780_v14, 16 }
  0x61   : > { %v782_v48 = vrot.slane %v781_v34, 4  ;;  %v801_v50 = vrot.slane %v799_v38, 4  ;;  %v884_v34 = vshrl.u32 %v2780_v14, 16 }
  0x63   : > { %v787_v60 = vsel %vm2478_vm2, %v782_v48, %v786_v7  ;;  %v924_v48 = vrot.slane %v922_v19, 5 }
  0x66   : > { %618 = vrot.lane.b32.xlu1 %v578_v45, %s2333_s24  ;;  %v796_v45 = vrot.slane %v794_v16, 5  ;;  %v866_v16 = vshll.u32 %v2837_v9, 16 }
  0x67   : > { %616 = vrot.lane.b32.xlu0 %v575_v46, %s2333_s24  ;;  %614 = vrot.lane.b32.xlu2 %v571_v22, %s2333_s24  ;;  %v2810_v46 = vrot.slane %v808_v27, 5  ;;  %v2850_v27 = vld [vmem:[%s2443_s14 + $0x2c] sm:$0x1] }
  0x6e   : > { %624 = vrot.lane.b32.xlu1 %v589_v52, %s2333_s24  ;;  %v856_v52 = vshll.u32 %v2754_v37, 16 }
  0x6f   : > { %622 = vrot.lane.b32.xlu0 %v585_v54, %s2333_s24  ;;  %620 = vrot.lane.b32.xlu2 %v582_v55, %s2333_s24  ;;  %v847_v54 = vshrl.u32 %v2760_v42, 16  ;;  %v797_v55 = vsel %vm2478_vm2, %v792_v44, %v796_v45 }
  0x71   : > { %v849_v58 = vrot.slane %v847_v54, 4 }
  0x76   : > { %630 = vrot.lane.b32.xlu1 %v599_v62, %s2333_s24  ;;  %v815_v62 = vor.u32 %v814_v24, %v2810_v46  ;;  %v842_v24 = vshll.u32 %v2850_v27, 16 }
  0x77   : > { %628 = vrot.lane.b32.xlu0 %v596_v63, %s2333_s24  ;;  %626 = vrot.lane.b32.xlu2 %v592_v43, %s2333_s24  ;;  %v818_v63 = vshll.u32 %v2011_v35, 16  ;;  %v836_v43 = vshrl.u32 %v2729_v0, 16  ;;  %v868_v35 = vrot.slane %v866_v16, 5  ;;  %v2026_v16 = vld [vmem:[%s2443_s14 + $0x5c] sm:$0x1] }
  0x78   : > { %v816_v33 = vrot.slane %v815_v62, 4  ;;  %v928_v62 = vshll.u32 %v2798_v32, 16 }
  0x79   : > { %v820_v7 = vrot.slane %v818_v63, 5  ;;  %v838_v12 = vrot.slane %v836_v43, 4 }
  0x7b   : > { %v821_v38 = vsel %vm2478_vm2, %v816_v33, %v820_v7  ;;  %v839_v45 = vor.u32 %v838_v12, %v834_v47 }
  0x7d   : > { %v840_v56 = vrot.slane %v839_v45, 4 }
  0x7e   : > { %713 = vrot.lane.b32.xlu1 %v2698_v61, %s2334_s27  ;;  %v2831_v61 = vld [vmem:[%s2443_s14 + $0x64] sm:$0xf] }
  0x7f   : > { %711 = vrot.lane.b32.xlu0 %v2703_v3, %s2334_s27  ;;  %709 = vrot.lane.b32.xlu2 %v2712_v2, %s2334_s27 }
  0x86   : > { %719 = vrot.lane.b32.xlu1 %v2729_v0, %s2334_s27 }
  0x87   : > { %717 = vrot.lane.b32.xlu0 %v2734_v1, %s2334_s27  ;;  %715 = vrot.lane.b32.xlu2 %v2010_v6, %s2334_s27  ;;  %v805_v6 = vor.u32 %v804_v51, %v801_v50  ;;  %v882_v50 = vrot.slane %v880_v30, 5  ;;  %v886_v51 = vrot.slane %v884_v34, 4  ;;  %v938_v34 = vshll.u32 %v2026_v16, 16 }
  0x89   : > { %v461_v31 = vpop.permute.xlu2 %460  ;;  %v940_v45 = vrot.slane %v938_v34, 5 }
  0x8a   : > { %505 = vst.msk [vmem:[#allocation2 + $0x10] sm:$0xf] %vm500_vm7, %v461_v31  ;;  %v2833_v31 = vrot.slane %v856_v52, 5 }
  0x8e   : > { %725 = vrot.lane.b32.xlu1 %v2751_v21, %s2334_s27 }
  0x8f   : > { %723 = vrot.lane.b32.xlu0 %v2754_v37, %s2334_s27  ;;  %721 = vrot.lane.b32.xlu2 %v2760_v42, %s2334_s27  ;;  %v862_v37 = vrot.slane %v860_v53, 4  ;;  %v830_v42 = vrot.slane %v829_v8, 4  ;;  %v876_v8 = vrot.slane %v874_v41, 5 }
  0x91   : > { %v463_v28 = vpop.permute.xlu2 %462  ;;  %v835_v10 = vsel %vm2478_vm2, %v830_v42, %v834_v47  ;;  %v863_v23 = vor.u32 %v862_v37, %v2833_v31  ;;  %v932_v42 = vshrl.u32 %v2798_v32, 16 }
  0x92   : > { %506 = vst.msk [vmem:[#allocation2 + $0x14] sm:$0xf] %vm500_vm7, %v463_v28  ;;  %v852_v28 = vrot.slane %v850_v59, 5 }
  0x93   : > { %v934_v12 = vrot.slane %v932_v42, 4 }
  0x94   : > { %v853_v4 = vor.u32 %v852_v28, %v849_v58 }
  0x96   : > { %731 = vrot.lane.b32.xlu1 %v2769_v15, %s2334_s27  ;;  %v854_v53 = vrot.slane %v853_v4, 4 }
  0x97   : > { %729 = vrot.lane.b32.xlu0 %v2774_v5, %s2334_s27  ;;  %727 = vrot.lane.b32.xlu2 %v2780_v14, %s2334_s27 }
  0x98   : > { %v457_v13 = vpop.permute.xlu1 %456  ;;  %v859_v43 = vsel %vm2478_vm2, %v854_v53, %v2833_v31  ;;  %v2915_v53 = vld [vmem:[%s2443_s14 + $0x4c] sm:$0xf] }
  0x99   : > { %503 = vst.msk [vmem:[#allocation2 + $0x8] sm:$0xf] %vm500_vm7, %v457_v13  ;;  %v453_v18 = vpop.permute.xlu0 %452  ;;  %v469_v25 = vpop.permute.xlu2 %468  ;;  %v919_v13 = vshrl.u32 %v2806_v39, 16 }
  0x9a   : > { %501 = vst.msk [vmem:[#allocation2] sm:$0xf] %vm500_vm7, %v453_v18  ;;  %v806_v18 = vrot.slane %v805_v6, 4  ;;  %v887_v6 = vor.u32 %v886_v51, %v882_v50  ;;  %v1086_v51 = vrot.slane %v2026_v16, 5 }
  0x9b   : > { %509 = vst.msk [vmem:[#allocation2 + $0x20] sm:$0xf] %vm500_vm7, %v469_v25 }
  0x9c   : > { %v811_v44 = vsel %vm2478_vm2, %v806_v18, %v2810_v46  ;;  %v873_v46 = vrot.slane %v871_v40, 4  ;;  %v888_v7 = vrot.slane %v887_v6, 4  ;;  %v1069_v18 = vrot.slane %v2780_v14, 5 }
  0x9d   : > { %v2034_v40 = vrot.slane %v2751_v21, 9 }
  0x9e   : > { %737 = vrot.lane.b32.xlu1 %v2794_v20, %s2334_s27  ;;  %v877_v58 = vor.u32 %v876_v8, %v873_v46  ;;  %v1071_v14 = vrot.slane %v1069_v18, 4 }
  0x9f   : > { %735 = vrot.lane.b32.xlu0 %v2798_v32, %s2334_s27  ;;  %733 = vrot.lane.b32.xlu2 %v2806_v39, %s2334_s27  ;;  %v1070_v21 = vsel %vm2610_vm5, %v2034_v40, %v1069_v18 }
  0xa0   : > { %v459_v22 = vpop.permute.xlu1 %458 }
  0xa1   : > { %504 = vst.msk [vmem:[#allocation2 + $0xc] sm:$0xf] %vm500_vm7, %v459_v22  ;;  %v455_v49 = vpop.permute.xlu0 %454  ;;  %v475_v57 = vpop.permute.xlu2 %474  ;;  %v921_v22 = vrot.slane %v919_v13, 4  ;;  %v878_v13 = vrot.slane %v877_v58, 4 }
  0xa2   : > { %502 = vst.msk [vmem:[#allocation2 + $0x4] sm:$0xf] %vm500_vm7, %v455_v49  ;;  %v864_v49 = vrot.slane %v863_v23, 4 }
  0xa3   : > { %512 = vst.msk [vmem:[#allocation2 + $0x2c] sm:$0xf] %vm500_vm7, %v475_v57  ;;  %v844_v57 = vrot.slane %v842_v24, 5 }
  0xa4   : > { %v869_v59 = vsel %vm2478_vm2, %v864_v49, %v868_v35 }
  0xa5   : > { %v845_v47 = vsel %vm2478_vm2, %v840_v56, %v844_v57 }
  0xa6   : > { %968 = vrot.lane.b32.xlu1 %v797_v55, %s2335_s30  ;;  %v2020_v55 = vld [vmem:[%s2443_s14 + $0x44] sm:$0x1] }
  0xa7   : > { %966 = vrot.lane.b32.xlu0 %v787_v60, %s2335_s30  ;;  %739 = vrot.lane.b32.xlu2 %v2831_v61, %s2334_s27  ;;  %v925_v60 = vor.u32 %v924_v48, %v921_v22  ;;  %v890_v37 = vshll.u32 %v2020_v55, 16  ;;  %v1083_v48 = vrot.slane %v2798_v32, 5  ;;  %s1896_s27 = scalar_lea.hbm %s3478_s4, %s2124_s23 }
  0xa8   : > { %v467_v29 = vpop.permute.xlu1 %466 }
  0xa9   : > { %508 = vst.msk [vmem:[#allocation2 + $0x1c] sm:$0xf] %vm500_vm7, %v467_v29  ;;  %v465_v11 = vpop.permute.xlu0 %464  ;;  %v481_v25 = vpop.permute.xlu2 %480  ;;  %v926_v28 = vrot.slane %v925_v60, 4  ;;  %v930_v29 = vrot.slane %v928_v62, 5  ;;  %v892_v31 = vrot.slane %v890_v37, 5  ;;  %v1379_v60 = vshrl.u32 %v2915_v53, 16 }
  0xaa   : > { %507 = vst.msk [vmem:[#allocation2 + $0x18] sm:$0xf] %vm500_vm7, %v465_v11 }
  0xab   : > { %515 = vst.msk [vmem:[#allocation2 + $0x38] sm:$0xf] %vm500_vm7, %v481_v25  ;;  %v931_v19 = vsel %vm2478_vm2, %v926_v28, %v930_v29  ;;  %v893_v23 = vsel %vm2478_vm2, %v888_v7, %v892_v31  ;;  %v883_v25 = vsel %vm2478_vm2, %v878_v13, %v882_v50  ;;  %v935_v30 = vor.u32 %v934_v12, %v930_v29  ;;  %v2054_v28 = vld [vmem:[%s2443_s14 + $0x50] sm:$0x1]  ;;  %v2941_v7 = vld [vmem:[%s2443_s14 + $0x64] sm:$0xf] }
  0xac   : > { %v1085_v50 = vrot.slane %v1083_v48, 4  ;;  %v1385_v18 = vshll.u32 %v2054_v28, 16 }
  0xae   : > { %974 = vrot.lane.b32.xlu1 %v835_v10, %s2335_s30  ;;  %v1087_v57 = vsel %vm2610_vm5, %v1085_v50, %v1086_v51  ;;  %v1387_v34 = vrot.slane %v1385_v18, 5 }
  0xaf   : > { %972 = vrot.lane.b32.xlu0 %v821_v38, %s2335_s30  ;;  %970 = vrot.lane.b32.xlu2 %v811_v44, %s2335_s30  ;;  %v1072_v38 = vrot.slane %v2020_v55, 5  ;;  %v936_v44 = vrot.slane %v935_v30, 4  ;;  %v2920_v55 = vld [vmem:[%s2443_s14 + $0x48] sm:$0xf] }
  0xb0   : > { %v473_v52 = vpop.permute.xlu1 %472  ;;  %v1366_v62 = vshrl.u32 %v2920_v55, 16  ;;  %v2068_v51 = vrot.slane %v2920_v55, 9 }
  0xb1   : > { %511 = vst.msk [vmem:[#allocation2 + $0x28] sm:$0xf] %vm500_vm7, %v473_v52  ;;  %v471_v54 = vpop.permute.xlu0 %470  ;;  %v603_v63 = vpop.permute.xlu2 %602  ;;  %v1073_v24 = vsel %vm2610_vm5, %v1071_v14, %v1072_v38  ;;  %v941_v49 = vsel %vm2478_vm2, %v936_v44, %v940_v45  ;;  %v2910_v52 = vld [vmem:[%s2443_s14 + $0x60] sm:$0xf] }
  0xb2   : > { %510 = vst.msk [vmem:[#allocation2 + $0x24] sm:$0xf] %vm500_vm7, %v471_v54  ;;  %v2036_v54 = vrot.slane %v2806_v39, 9  ;;  %v1414_v46 = vshrl.u32 %v2910_v52, 16  ;;  %v1417_v8 = vshll.u32 %v2910_v52, 16  ;;  %v1369_v39 = vshll.u32 %v2920_v55, 16 }
  0xb3   : > { %650 = vst.msk [vmem:[#allocation2 + $0x4] sm:$0xf] %vm648_vm8, %v603_v63  ;;  %v1368_v29 = vrot.slane %v1366_v62, 4 }
  0xb4   : > { %v1084_v63 = vsel %vm2610_vm5, %v2036_v54, %v1083_v48  ;;  %v1419_v6 = vrot.slane %v1417_v8, 5 }
  0xb6   : > { %980 = vrot.lane.b32.xlu1 %v869_v59, %s2335_s30  ;;  %v1375_v59 = vshll.u32 %v2915_v53, 16 }
  0xb7   : > { %978 = vrot.lane.b32.xlu0 %v859_v43, %s2335_s30  ;;  %976 = vrot.lane.b32.xlu2 %v845_v47, %s2335_s30  ;;  %v1416_v43 = vrot.slane %v1414_v46, 4  ;;  %v1381_v47 = vrot.slane %v1379_v60, 4  ;;  %v1041_v60 = vrot.slane %v2703_v3, 5 }
  0xb8   : > { %v479_v33 = vpop.permute.xlu1 %478  ;;  %v1377_v42 = vrot.slane %v1375_v59, 5  ;;  %v2030_v59 = vrot.slane %v2712_v2, 9 }
  0xb9   : > { %514 = vst.msk [vmem:[#allocation2 + $0x34] sm:$0xf] %vm500_vm7, %v479_v33  ;;  %v477_v11 = vpop.permute.xlu0 %476  ;;  %v609_v10 = vpop.permute.xlu2 %608  ;;  %v1371_v33 = vrot.slane %v1369_v39, 5  ;;  %v1420_v31 = vor.u32 %v1419_v6, %v1416_v43  ;;  %v2070_v6 = vrot.slane %v2910_v52, 9 }
  0xba   : > { %513 = vst.msk [vmem:[#allocation2 + $0x30] sm:$0xf] %vm500_vm7, %v477_v11  ;;  %v1423_v11 = vshll.u32 %v2941_v7, 16  ;;  %v1382_v13 = vor.u32 %v1381_v47, %v1377_v42  ;;  %v1042_v2 = vsel %vm2610_vm5, %v2030_v59, %v1041_v60 }
  0xbb   : > { %653 = vst.msk [vmem:[#allocation2 + $0x10] sm:$0xf] %vm648_vm8, %v609_v10  ;;  %v1372_v10 = vor.u32 %v1371_v33, %v1368_v29  ;;  %v2998_v29 = vld [vmem:[%s2443_s14 + $0x1c] sm:$0xf] }
  0xbc   : > { %v1425_v16 = vrot.slane %v1423_v11, 5  ;;  %v1383_v30 = vrot.slane %v1382_v13, 4  ;;  %v1044_v11 = vrot.slane %v2785_v17, 5 }
  0xbe   : > { %990 = vrot.lane.b32.xlu1 %v931_v19, %s2335_s30  ;;  %v1427_v19 = vshrl.u32 %v2941_v7, 16  ;;  %v1388_v45 = vsel %vm2478_vm2, %v1383_v30, %v1387_v34  ;;  %v3021_v30 = vld [vmem:[%s2443_s14 + $0x20] sm:$0x1] }
  0xbf   : > { %984 = vrot.lane.b32.xlu0 %v893_v23, %s2335_s30  ;;  %982 = vrot.lane.b32.xlu2 %v883_v25, %s2335_s30  ;;  %v1421_v23 = vrot.slane %v1420_v31, 4  ;;  %v1043_v31 = vrot.slane %v1041_v60, 4 }
  0xc0   : > { %v601_v4 = vpop.permute.xlu1 %600  ;;  %v1429_v38 = vrot.slane %v1427_v19, 4 }
  0xc1   : > { %649 = vst.msk [vmem:[#allocation2] sm:$0xf] %vm648_vm8, %v601_v4  ;;  %v483_v41 = vpop.permute.xlu0 %482  ;;  %v615_v22 = vpop.permute.xlu2 %614  ;;  %v1373_v4 = vrot.slane %v1372_v10, 4  ;;  %v1426_v40 = vsel %vm2478_vm2, %v1421_v23, %v1425_v16  ;;  %v1045_v17 = vsel %vm2610_vm5, %v1043_v31, %v1044_v11  ;;  %v895_v11 = vshrl.u32 %v2774_v5, 16 }
  0xc2   : > { %516 = vst.msk [vmem:[#allocation2 + $0x3c] sm:$0xf] %vm500_vm7, %v483_v41  ;;  %v1564_v41 = vrot.slane %v2915_v53, 5  ;;  %v1430_v48 = vor.u32 %v1429_v38, %v1425_v16 }
  0xc3   : > { %656 = vst.msk [vmem:[#allocation2 + $0x1c] sm:$0xf] %vm648_vm8, %v615_v22  ;;  %v1378_v22 = vsel %vm2478_vm2, %v1373_v4, %v1377_v42  ;;  %v3026_v4 = vld [vmem:[%s2443_s14 + $0x34] sm:$0xf] }
  0xc6   : > { %1113 = vrot.lane.b32.xlu1 %v1073_v24, %s2336_s5  ;;  %v2060_v24 = vld [vmem:[%s2443_s14 + $0x68] sm:$0x1] }
  0xc7   : > { %1111 = vrot.lane.b32.xlu0 %v1070_v21, %s2336_s5  ;;  %992 = vrot.lane.b32.xlu2 %v941_v49, %s2335_s30  ;;  %v1433_v21 = vshll.u32 %v2060_v24, 16  ;;  %v1566_v49 = vrot.slane %v1564_v41, 4 }
  0xc8   : > { %v607_v35 = vpop.permute.xlu1 %606 }
  0xc9   : > { %652 = vst.msk [vmem:[#allocation2 + $0xc] sm:$0xf] %vm648_vm8, %v607_v35  ;;  %v605_v32 = vpop.permute.xlu0 %604  ;;  %v621_v56 = vpop.permute.xlu2 %620  ;;  %v1567_v35 = vrot.slane %v2054_v28, 5  ;;  %v1435_v54 = vrot.slane %v1433_v21, 5  ;;  %v2032_v28 = vrot.slane %v2734_v1, 9  ;;  %v1279_v1 = vshll.u32 %v2998_v29, 16 }
  0xca   : > { %651 = vst.msk [vmem:[#allocation2 + $0x8] sm:$0xf] %vm648_vm8, %v605_v32 }
  0xcb   : > { %659 = vst.msk [vmem:[#allocation2 + $0x28] sm:$0xf] %vm648_vm8, %v621_v56  ;;  %v1568_v46 = vsel %vm2610_vm5, %v1566_v49, %v1567_v35  ;;  %v1578_v56 = vrot.slane %v2941_v7, 5  ;;  %v1281_v23 = vrot.slane %v1279_v1, 5 }
  0xcd   : > { %v1580_v39 = vrot.slane %v1578_v56, 4  ;;  %v1579_v47 = vsel %vm2610_vm5, %v2070_v6, %v1578_v56  ;;  %v1536_v6 = vrot.slane %v2998_v29, 5 }
  0xce   : > { %1220 = vrot.lane.b32.xlu1 %v2920_v55, %s2337_s6 }
  0xcf   : > { %1121 = vrot.lane.b32.xlu0 %v1087_v57, %s2336_s5  ;;  %1119 = vrot.lane.b32.xlu2 %v1084_v63, %s2336_s5  ;;  %v1565_v57 = vsel %vm2610_vm5, %v2068_v51, %v1564_v41  ;;  %v1581_v63 = vrot.slane %v2060_v24, 5 }
  0xd0   : > { %v613_v37 = vpop.permute.xlu1 %612 }
  0xd1   : > { %655 = vst.msk [vmem:[#allocation2 + $0x18] sm:$0xf] %vm648_vm8, %v613_v37  ;;  %v611_v58 = vpop.permute.xlu0 %610  ;;  %v627_v12 = vpop.permute.xlu2 %626  ;;  %v1055_v37 = vrot.slane %v2729_v0, 5  ;;  %v1582_v42 = vsel %vm2610_vm5, %v1580_v39, %v1581_v63  ;;  %v1058_v0 = vrot.slane %v2850_v27, 5 }
  0xd2   : > { %654 = vst.msk [vmem:[#allocation2 + $0x14] sm:$0xf] %vm648_vm8, %v611_v58 }
  0xd3   : > { %662 = vst.msk [vmem:[#allocation2 + $0x34] sm:$0xf] %vm648_vm8, %v627_v12  ;;  %v1283_v12 = vshrl.u32 %v2998_v29, 16  ;;  %v1056_v18 = vsel %vm2610_vm5, %v2032_v28, %v1055_v37  ;;  %v1550_v28 = vrot.slane %v3026_v4, 5 }
  0xd5   : > { %v1285_v16 = vrot.slane %v1283_v12, 4 }
  0xd6   : > { %1230 = vrot.lane.b32.xlu1 %v2941_v7, %s2337_s6  ;;  %v3003_v7 = vld [vmem:[%s2443_s14 + $0x18] sm:$0xf] }
  0xd7   : > { %1228 = vrot.lane.b32.xlu0 %v2910_v52, %s2337_s6  ;;  %1222 = vrot.lane.b32.xlu2 %v2915_v53, %s2337_s6  ;;  %v1431_v53 = vrot.slane %v1430_v48, 4  ;;  %v1057_v52 = vrot.slane %v1055_v37, 4  ;;  %v1270_v19 = vshrl.u32 %v3003_v7, 16  ;;  %v1273_v10 = vshll.u32 %v3003_v7, 16 }
  0xd8   : > { %v619_v25 = vpop.permute.xlu1 %618  ;;  %v1286_v41 = vor.u32 %v1285_v16, %v1281_v23  ;;  %v1331_v48 = vshrl.u32 %v3026_v4, 16 }
  0xd9   : > { %658 = vst.msk [vmem:[#allocation2 + $0x24] sm:$0xf] %vm648_vm8, %v619_v25  ;;  %v617_v14 = vpop.permute.xlu0 %616  ;;  %v710_v44 = vpop.permute.xlu2 %709  ;;  %v1436_v55 = vsel %vm2478_vm2, %v1431_v53, %v1435_v54  ;;  %v1059_v27 = vsel %vm2610_vm5, %v1057_v52, %v1058_v0  ;;  %v1272_v34 = vrot.slane %v1270_v19, 4  ;;  %v946_v0 = vshll.u32 %v2794_v20, 16 }
  0xda   : > { %657 = vst.msk [vmem:[#allocation2 + $0x20] sm:$0xf] %vm648_vm8, %v617_v14  ;;  %v1275_v14 = vrot.slane %v1273_v10, 5  ;;  %v1287_v35 = vrot.slane %v1286_v41, 4  ;;  %v1333_v54 = vrot.slane %v1331_v48, 4  ;;  %v1539_v41 = vrot.slane %v3021_v30, 5 }
  0xdb   : > { %758 = vst.msk [vmem:[#allocation2] sm:$0xf] %vm757_vm9, %v710_v44  ;;  %v1289_v44 = vshll.u32 %v3021_v30, 16 }
  0xdc   : > { %v1276_v24 = vor.u32 %v1275_v14, %v1272_v34  ;;  %v2023_v34 = vld [vmem:[%s2443_s14 + $0x50] sm:$0x1]  ;;  %v897_v14 = vrot.slane %v895_v11, 4  ;;  %v3127_v11 = vld [vmem:[%s2443_s14 + $0x58] sm:$0xf] }
  0xde   : > { %1485 = vrot.lane.b32.xlu1 %v1426_v40, %s2338_s8  ;;  %v3030_v40 = vld [vmem:[%s2443_s14 + $0x30] sm:$0xf] }
  0xdf   : > { %1479 = vrot.lane.b32.xlu0 %v1388_v45, %s2338_s8  ;;  %1477 = vrot.lane.b32.xlu2 %v1378_v22, %s2338_s8  ;;  %v1327_v22 = vshll.u32 %v3026_v4, 16  ;;  %v1318_v21 = vshrl.u32 %v3030_v40, 16  ;;  %v1321_v49 = vshll.u32 %v3030_v40, 16  ;;  %v2066_v16 = vrot.slane %v3030_v40, 9 }
  0xe0   : > { %v625_v50 = vpop.permute.xlu1 %624 }
  0xe1   : > { %661 = vst.msk [vmem:[#allocation2 + $0x30] sm:$0xf] %vm648_vm8, %v625_v50  ;;  %v623_v32 = vpop.permute.xlu0 %622  ;;  %v716_v8 = vpop.permute.xlu2 %715  ;;  %v1291_v50 = vrot.slane %v1289_v44, 5  ;;  %v1329_v53 = vrot.slane %v1327_v22, 5  ;;  %v1320_v56 = vrot.slane %v1318_v21, 4  ;;  %v1551_v22 = vsel %vm2610_vm5, %v2066_v16, %v1550_v28 }
  0xe2   : > { %660 = vst.msk [vmem:[#allocation2 + $0x2c] sm:$0xf] %vm648_vm8, %v623_v32  ;;  %v1277_v32 = vrot.slane %v1276_v24, 4  ;;  %v952_v24 = vshll.u32 %v2831_v61, 16  ;;  %v914_v21 = vshll.u32 %v2023_v34, 16 }
  0xe3   : > { %761 = vst.msk [vmem:[#allocation2 + $0xc] sm:$0xf] %vm757_vm9, %v716_v8  ;;  %v2048_v8 = vld [vmem:[%s2443_s14 + $0x38] sm:$0x1] }
  0xe4   : > { %v1282_v60 = vsel %vm2478_vm2, %v1277_v32, %v1281_v23  ;;  %v1337_v39 = vshll.u32 %v2048_v8, 16  ;;  %v1553_v19 = vrot.slane %v2048_v8, 5 }
  0xe6   : > { %1608 = vrot.lane.b32.xlu1 %v1568_v46, %s2339_s9 }
  0xe7   : > { %1606 = vrot.lane.b32.xlu0 %v1565_v57, %s2339_s9  ;;  %1487 = vrot.lane.b32.xlu2 %v1436_v55, %s2338_s8  ;;  %v1323_v57 = vrot.slane %v1321_v49, 5  ;;  %v1292_v55 = vsel %vm2478_vm2, %v1287_v35, %v1291_v50  ;;  %v956_v49 = vshrl.u32 %v2831_v61, 16 }
  0xe8   : > { %v631_v62 = vpop.permute.xlu1 %630 }
  0xe9   : > { %664 = vst.msk [vmem:[#allocation2 + $0x3c] sm:$0xf] %vm648_vm8, %v631_v62  ;;  %v629_v43 = vpop.permute.xlu0 %628  ;;  %v722_v3 = vpop.permute.xlu2 %721  ;;  %v1334_v62 = vor.u32 %v1333_v54, %v1329_v53  ;;  %v1324_v63 = vor.u32 %v1323_v57, %v1320_v56  ;;  %v916_v54 = vrot.slane %v914_v21, 5  ;;  %v958_v8 = vrot.slane %v956_v49, 4  ;;  %v1675_v49 = vld [vmem:[%s3475_s1 + $0x10] sm:$0x3] }
  0xea   : > { %663 = vst.msk [vmem:[#allocation2 + $0x38] sm:$0xf] %vm648_vm8, %v629_v43  ;;  %v2064_v43 = vrot.slane %v3003_v7, 9  ;;  %v1076_v57 = vrot.slane %v2769_v15, 5 }
  0xeb   : > { %764 = vst.msk [vmem:[#allocation2 + $0x18] sm:$0xf] %vm757_vm9, %v722_v3  ;;  %v1339_v3 = vrot.slane %v1337_v39, 5  ;;  %v1325_v52 = vrot.slane %v1324_v63, 4 }
  0xed   : > { %v1330_v1 = vsel %vm2478_vm2, %v1325_v52, %v1329_v53 }
  0xee   : > { %1095 = vrot.lane.b32.xlu1 %v1042_v2, %s2336_s5  ;;  %v1335_v2 = vrot.slane %v1334_v62, 4  ;;  %v2029_v62 = vld [vmem:[%s2443_s14 + $0x68] sm:$0x1] }
  0xef   : > { %1616 = vrot.lane.b32.xlu0 %v1582_v42, %s2339_s9  ;;  %1614 = vrot.lane.b32.xlu2 %v1579_v47, %s2339_s9  ;;  %v943_v47 = vshrl.u32 %v2794_v20, 16 }
  0xf0   : > { %v714_v58 = vpop.permute.xlu1 %713  ;;  %v1340_v31 = vsel %vm2478_vm2, %v1335_v2, %v1339_v3  ;;  %v2035_v2 = vrot.slane %v2774_v5, 9 }
  0xf1   : > { %760 = vst.msk [vmem:[#allocation2 + $0x8] sm:$0xf] %vm757_vm9, %v714_v58  ;;  %v712_v33 = vpop.permute.xlu0 %711  ;;  %v728_v13 = vpop.permute.xlu2 %727  ;;  %v1537_v58 = vsel %vm2610_vm5, %v2064_v43, %v1536_v6  ;;  %v945_v12 = vrot.slane %v943_v47, 4  ;;  %v962_v43 = vshll.u32 %v2029_v62, 16 }
  0xf2   : > { %759 = vst.msk [vmem:[#allocation2 + $0x4] sm:$0xf] %vm757_vm9, %v712_v33  ;;  %v904_v33 = vshll.u32 %v2769_v15, 16 }
  0xf3   : > { %767 = vst.msk [vmem:[#allocation2 + $0x24] sm:$0xf] %vm757_vm9, %v728_v13  ;;  %v948_v13 = vrot.slane %v946_v0, 5  ;;  %v964_v47 = vrot.slane %v962_v43, 5  ;;  %v1571_v43 = vrot.slane %v3127_v11, 5 }
  0xf4   : > { %v906_v10 = vrot.slane %v904_v33, 5 }
  0xf6   : > { %1105 = vrot.lane.b32.xlu1 %v1059_v27, %s2336_s5  ;;  %v898_v27 = vshll.u32 %v2774_v5, 16  ;;  %v1077_v5 = vsel %vm2610_vm5, %v2035_v2, %v1076_v57 }
  0xf7   : > { %1103 = vrot.lane.b32.xlu0 %v1056_v18, %s2336_s5  ;;  %1097 = vrot.lane.b32.xlu2 %v1045_v17, %s2336_s5  ;;  %v1552_v18 = vrot.slane %v1550_v28, 4 }
  0xf8   : > { %v720_v25 = vpop.permute.xlu1 %719 }
  0xf9   : > { %763 = vst.msk [vmem:[#allocation2 + $0x14] sm:$0xf] %vm757_vm9, %v720_v25  ;;  %v718_v38 = vpop.permute.xlu0 %717  ;;  %v734_v45 = vpop.permute.xlu2 %733  ;;  %v1554_v44 = vsel %vm2610_vm5, %v1552_v18, %v1553_v19 }
  0xfa   : > { %762 = vst.msk [vmem:[#allocation2 + $0x10] sm:$0xf] %vm757_vm9, %v718_v38  ;;  %v900_v38 = vrot.slane %v898_v27, 5  ;;  %v2037_v27 = vrot.slane %v2794_v20, 9 }
  0xfb   : > { %770 = vst.msk [vmem:[#allocation2 + $0x30] sm:$0xf] %vm757_vm9, %v734_v45  ;;  %v949_v45 = vor.u32 %v948_v13, %v945_v12 }
  0xfc   : > { %v901_v35 = vor.u32 %v900_v38, %v897_v14 }
  0xfd   : > { %v950_v50 = vrot.slane %v949_v45, 4  ;;  %v3152_v45 = vld [vmem:[%s2443_s14 + $0x5c] sm:$0x1] }
  0xfe   : > { %1212 = vrot.lane.b32.xlu1 %v3030_v40, %s2337_s6  ;;  %v902_v56 = vrot.slane %v901_v35, 4  ;;  %v1409_v35 = vshll.u32 %v3152_v45, 16 }
  0xff   : > { %1206 = vrot.lane.b32.xlu0 %v2998_v29, %s2337_s6  ;;  %1204 = vrot.lane.b32.xlu2 %v3003_v7, %s2337_s6  ;;  %v908_v7 = vshrl.u32 %v2769_v15, 16  ;;  %v1078_v15 = vrot.slane %v1076_v57, 4 }
 0x100   : > { %v726_v51 = vpop.permute.xlu1 %725  ;;  %v907_v39 = vsel %vm2478_vm2, %v902_v56, %v906_v10  ;;  %v1411_v57 = vrot.slane %v1409_v35, 5 }
 0x101   : > { %766 = vst.msk [vmem:[#allocation2 + $0x20] sm:$0xf] %vm757_vm9, %v726_v51  ;;  %v724_v46 = vpop.permute.xlu0 %723  ;;  %v740_v59 = vpop.permute.xlu2 %739  ;;  %v910_v17 = vrot.slane %v908_v7, 4  ;;  %v954_v51 = vrot.slane %v952_v24, 5  ;;  %v1093_v7 = vrot.slane %v2029_v62, 5 }
 0x102   : > { %765 = vst.msk [vmem:[#allocation2 + $0x1c] sm:$0xf] %vm757_vm9, %v724_v46 }
 0x103   : > { %773 = vst.msk [vmem:[#allocation2 + $0x3c] sm:$0xf] %vm757_vm9, %v740_v59  ;;  %v911_v48 = vor.u32 %v910_v17, %v906_v10  ;;  %v959_v63 = vor.u32 %v958_v8, %v954_v51  ;;  %v1399_v10 = vshll.u32 %v3127_v11, 16  ;;  %v1403_v17 = vshrl.u32 %v3127_v11, 16 }
 0x105   : > { %v912_v53 = vrot.slane %v911_v48, 4  ;;  %v3147_v38 = vrot.slane %v1399_v10, 5 }
 0x106   : > { %1463 = vrot.lane.b32.xlu1 %v1292_v55, %s2338_s8  ;;  %v955_v55 = vsel %vm2478_vm2, %v950_v50, %v954_v51  ;;  %v1725_v50 = vunpack.c.l.b16 %v1675_v49 }
 0x107   : > { %1461 = vrot.lane.b32.xlu0 %v1282_v60, %s2338_s8  ;;  %1214 = vrot.lane.b32.xlu2 %v3026_v4, %s2337_s6  ;;  %v1538_v4 = vrot.slane %v1536_v6, 4  ;;  %v917_v60 = vsel %vm2478_vm2, %v912_v53, %v916_v54  ;;  %v1079_v6 = vrot.slane %v2023_v34, 5 }
 0x108   : > { %v732_v37 = vpop.permute.xlu1 %731 }
 0x109   : > { %769 = vst.msk [vmem:[#allocation2 + $0x2c] sm:$0xf] %vm757_vm9, %v732_v37  ;;  %v730_v42 = vpop.permute.xlu0 %729  ;;  %v971_v29 = vpop.permute.xlu2 %970  ;;  %v1540_v30 = vsel %vm2610_vm5, %v1538_v4, %v1539_v41  ;;  %v1080_v52 = vsel %vm2610_vm5, %v1078_v15, %v1079_v6  ;;  %v1405_v4 = vrot.slane %v1403_v17, 4 }
 0x10a   : > { %768 = vst.msk [vmem:[#allocation2 + $0x28] sm:$0xf] %vm757_vm9, %v730_v42  ;;  %v960_v42 = vrot.slane %v959_v63, 4 }
 0x10b   : > { %1017 = vst.msk [vmem:[#allocation2 + $0x8] sm:$0xf] %vm1014_vm10, %v971_v29 }
 0x10c   : > { %v965_v28 = vsel %vm2478_vm2, %v960_v42, %v964_v47  ;;  %v2136_v47 = vld [vmem:[%s3475_s1] sm:$0xff] }
 0x10e   : > { %1590 = vrot.lane.b32.xlu1 %v1537_v58, %s2339_s9  ;;  %v1090_v58 = vrot.slane %v2831_v61, 5 }
 0x10f   : > { %1471 = vrot.lane.b32.xlu0 %v1340_v31, %s2338_s8  ;;  %1469 = vrot.lane.b32.xlu2 %v1330_v1, %s2338_s8  ;;  %v3122_v31 = vld [vmem:[%s2443_s14 + $0x6c] sm:$0xf]  ;;  %v3132_v1 = vld [vmem:[%s2443_s14 + $0x54] sm:$0xf] }
 0x110   : > { %v738_v23 = vpop.permute.xlu1 %737  ;;  %v1092_v33 = vrot.slane %v1090_v58, 4  ;;  %v1438_v12 = vshrl.u32 %v3122_v31, 16  ;;  %v1441_v13 = vshll.u32 %v3122_v31, 16  ;;  %v1393_v16 = vshll.u32 %v3132_v1, 16 }
 0x111   : > { %772 = vst.msk [vmem:[#allocation2 + $0x38] sm:$0xf] %vm757_vm9, %v738_v23  ;;  %v736_v25 = vpop.permute.xlu0 %735  ;;  %v977_v40 = vpop.permute.xlu2 %976  ;;  %v1390_v23 = vshrl.u32 %v3132_v1, 16  ;;  %v1091_v20 = vsel %vm2610_vm5, %v2037_v27, %v1090_v58 }
 0x112   : > { %771 = vst.msk [vmem:[#allocation2 + $0x34] sm:$0xf] %vm757_vm9, %v736_v25  ;;  %v1094_v19 = vsel %vm2610_vm5, %v1092_v33, %v1093_v7  ;;  %v1440_v25 = vrot.slane %v1438_v12, 4  ;;  %v1443_v34 = vrot.slane %v1441_v13, 5  ;;  %v1395_v24 = vrot.slane %v1393_v16, 5 }
 0x113   : > { %1020 = vst.msk [vmem:[#allocation2 + $0x14] sm:$0xf] %vm1014_vm10, %v977_v40  ;;  %v1392_v41 = vrot.slane %v1390_v23, 4  ;;  %v3156_v40 = vld [vmem:[%s2443_s14 + $0x70] sm:$0xf] }
 0x114   : > { %v1447_v48 = vshll.u32 %v3156_v40, 16  ;;  %v1451_v51 = vshrl.u32 %v3156_v40, 16  ;;  %v2231_v12 = vld [vmem:[%s2443_s14 + $0x18] sm:$0xf] }
 0x115   : > { %v2031_v13 = vrot.slane %v2231_v12, 9 }
 0x116   : > { %1600 = vrot.lane.b32.xlu1 %v1554_v44, %s2339_s9  ;;  %v1449_v54 = vrot.slane %v1447_v48, 5 }
 0x117   : > { %1598 = vrot.lane.b32.xlu0 %v1551_v22, %s2339_s9  ;;  %1592 = vrot.lane.b32.xlu2 %v1540_v30, %s2339_s9  ;;  %v1444_v22 = vor.u32 %v1443_v34, %v1440_v25  ;;  %v1406_v30 = vor.u32 %v1405_v4, %v3147_v38  ;;  %v2233_v25 = vld [vmem:[%s2443_s14 + $0x34] sm:$0xf] }
 0x118   : > { %v969_v32 = vpop.permute.xlu1 %968  ;;  %v1062_v34 = vrot.slane %v2233_v25, 5 }
 0x119   : > { %1016 = vst.msk [vmem:[#allocation2 + $0x4] sm:$0xf] %vm1014_vm10, %v969_v32  ;;  %v967_v46 = vpop.permute.xlu0 %966  ;;  %v983_v59 = vpop.permute.xlu2 %982  ;;  %v1396_v32 = vor.u32 %v1395_v24, %v1392_v41  ;;  %v1445_v53 = vrot.slane %v1444_v22, 4  ;;  %v1407_v56 = vrot.slane %v1406_v30, 4  ;;  %v2234_v24 = vld [vmem:[%s2443_s14 + $0x30] sm:$0xf] }
 0x11a   : > { %1015 = vst.msk [vmem:[#allocation2] sm:$0xf] %vm1014_vm10, %v967_v46  ;;  %v1728_v46 = vpack.c.b16 %v1725_v50, %v1725_v50  ;;  %v3226_v22 = vld [vmem:[%s2443_s14 + $0x28] sm:$0xf]  ;;  %v2235_v30 = vld [vmem:[%s2443_s14 + $0x20] sm:$0x1] }
 0x11b   : > { %1023 = vst.msk [vmem:[#allocation2 + $0x20] sm:$0xf] %vm1014_vm10, %v983_v59  ;;  %v1397_v62 = vrot.slane %v1396_v32, 4  ;;  %v1450_v63 = vsel %vm2478_vm2, %v1445_v53, %v1449_v54  ;;  %v1412_v6 = vsel %vm2478_vm2, %v1407_v56, %v1411_v57  ;;  %v1051_v35 = vrot.slane %v2235_v30, 5 }
 0x11c   : > { %v1758_v59 = vsel %vm1756_vm12, %v1728_v46, 0  ;;  %v1303_v50 = vshll.u32 %v3226_v22, 16 }
 0x11d   : > { %2140 = vmatpush.bf16.msra.mxu2 %v1758_v59  ;;  %2141 = vmatpush.bf16.msra.mxu3 %v1758_v59  ;;  %v1402_v2 = vsel %vm2478_vm2, %v1397_v62, %v3147_v38 }
 0x11e   : > { %994 = vrot.lane.b32.xlu1 %v955_v55, %s2335_s30  ;;  %1765 = vmatpush.bf16.msra.mxu0 %v1758_v59  ;;  %v1305_v56 = vrot.slane %v1303_v50, 5 }
 0x11f   : > { %988 = vrot.lane.b32.xlu0 %v917_v60, %s2335_s30  ;;  %986 = vrot.lane.b32.xlu2 %v907_v39, %s2335_s30  ;;  %v1453_v60 = vrot.slane %v1451_v51, 4  ;;  %v2137_v39 = vld [vmem:[%s3475_s1 + $0x8] sm:$0xff]  ;;  %v1307_v51 = vshrl.u32 %v3226_v22, 16 }
 0x120   : > { %v975_v37 = vpop.permute.xlu1 %974  ;;  %2139 = vmatpush.bf16.msra.mxu1 %v1758_v59  ;;  %v3250_v59 = vld [vmem:[%s2443_s14 + $0x2c] sm:$0x1] }
 0x121   : > { %1019 = vst.msk [vmem:[#allocation2 + $0x10] sm:$0xf] %vm1014_vm10, %v975_v37  ;;  %v973_v3 = vpop.permute.xlu0 %972  ;;  %v993_v0 = vpop.permute.xlu2 %992  ;;  %v2063_v37 = vld [vmem:[%s2443_s14 + $0x74] sm:$0x1]  ;;  %2143 = vmatpush.bf16.msra.mxu2 %v2137_v39  ;;  %2144 = vmatpush.bf16.msra.mxu3 %v2137_v39  ;;  %v1309_v57 = vrot.slane %v1307_v51, 4 }
 0x122   : > { %1018 = vst.msk [vmem:[#allocation2 + $0xc] sm:$0xf] %vm1014_vm10, %v973_v3  ;;  %v1454_v3 = vor.u32 %v1453_v60, %v1449_v54  ;;  %v1457_v42 = vshll.u32 %v2063_v37, 16  ;;  %1766 = vmatpush.bf16.msra.mxu0 %v2137_v39  ;;  %v1588_v23 = vrot.slane %v2063_v37, 5 }
 0x123   : > { %1028 = vst.msk [vmem:[#allocation2 + $0x34] sm:$0xf] %vm1014_vm10, %v993_v0  ;;  %v1574_v0 = vrot.slane %v3152_v45, 5 }
 0x124   : > { %2142 = vmatpush.bf16.msra.mxu1 %v2137_v39  ;;  %v1459_v33 = vrot.slane %v1457_v42, 5 }
 0x125   : > { %2146 = vmatpush.bf16.msra.mxu2 %v2136_v47  ;;  %2147 = vmatpush.bf16.msra.mxu3 %v2136_v47 }
 0x126   : > { %1117 = vrot.lane.b32.xlu1 %v1080_v52, %s2336_s5  ;;  %v1573_v52 = vrot.slane %v1571_v43, 4  ;;  %1767 = vmatpush.bf16.msra.mxu0 %v2136_v47 }
 0x127   : > { %1115 = vrot.lane.b32.xlu0 %v1077_v5, %s2336_s5  ;;  %996 = vrot.lane.b32.xlu2 %v965_v28, %s2335_s30  ;;  %v2069_v5 = vrot.slane %v3132_v1, 9  ;;  %s1899_s30 = sshll.u32 %s1896_s27, 4  ;;  %s1900_s30 = int_to_ptr.hbm [resolvable:$true] %s1899_s30 }
 0x128   : > { %v981_v29 = vpop.permute.xlu1 %980  ;;  %v1575_v7 = vsel %vm2610_vm5, %v1573_v52, %v1574_v0  ;;  %2145 = vmatpush.bf16.msra.mxu1 %v2136_v47 }
 0x129   : > { %1022 = vst.msk [vmem:[#allocation2 + $0x1c] sm:$0xf] %vm1014_vm10, %v981_v29  ;;  %v979_v61 = vpop.permute.xlu0 %978  ;;  %v1120_v18 = vpop.permute.xlu2 %1119  ;;  %v1455_v29 = vrot.slane %v1454_v3, 4  ;;  %v1572_v27 = vsel %vm2610_vm5, %v2069_v5, %v1571_v43  ;;  %v3259_v43 = vld [vmem:[%s2443_s14 + $0x3c] sm:$0xf] }
 0x12a   : > { %1021 = vst.msk [vmem:[#allocation2 + $0x18] sm:$0xf] %vm1014_vm10, %v979_v61  ;;  %v1342_v47 = vshrl.u32 %v3259_v43, 16  ;;  %v1345_v52 = vshll.u32 %v3259_v43, 16 }
 0x12e   : > { %1224 = vrot.lane.b32.xlu1 %v3132_v1, %s2337_s6  ;;  %v1460_v1 = vsel %vm2478_vm2, %v1455_v29, %v1459_v33 }
 0x12f   : > { %1125 = vrot.lane.b32.xlu0 %v1094_v19, %s2336_s5  ;;  %1123 = vrot.lane.b32.xlu2 %v1091_v20, %s2336_s5  ;;  %v2071_v20 = vrot.slane %v3122_v31, 9 }
 0x130   : > { %v991_v14 = vpop.permute.xlu1 %990 }
 0x131   : > { %1027 = vst.msk [vmem:[#allocation2 + $0x30] sm:$0xf] %vm1014_vm10, %v991_v14  ;;  %v985_v44 = vpop.permute.xlu0 %984  ;;  %v1223_v21 = vpop.permute.xlu2 %1222 }
 0x132   : > { %1024 = vst.msk [vmem:[#allocation2 + $0x24] sm:$0xf] %vm1014_vm10, %v985_v44  ;;  %v1065_v44 = vrot.slane %v2837_v9, 5 }
 0x133   : > { %1156 = vst.msk [vmem:[#allocation2 + $0x30] sm:$0xf] %vm1143_vm11, %v1120_v18  ;;  %v2232_v18 = vld [vmem:[%s2443_s14 + $0x1c] sm:$0xf] }
 0x134   : > { %v1048_v19 = vrot.slane %v2232_v18, 5 }
 0x136   : > { %1234 = vrot.lane.b32.xlu1 %v3156_v40, %s2337_s6  ;;  %v1049_v14 = vsel %vm2610_vm5, %v2031_v13, %v1048_v19  ;;  %v1050_v49 = vrot.slane %v1048_v19, 4 }
 0x137   : > { %1232 = vrot.lane.b32.xlu0 %v3122_v31, %s2337_s6  ;;  %1226 = vrot.lane.b32.xlu2 %v3127_v11, %s2337_s6  ;;  %v1585_v11 = vrot.slane %v3156_v40, 5  ;;  %v1064_v31 = vrot.slane %v1062_v34, 4  ;;  %v2033_v40 = vrot.slane %v2234_v24, 9 }
 0x138   : > { %v1114_v8 = vpop.permute.xlu1 %1113 }
 0x139   : > { %1153 = vst.msk [vmem:[#allocation2 + $0x24] sm:$0xf] %vm1143_vm11, %v1114_v8  ;;  %v1112_v55 = vpop.permute.xlu0 %1111  ;;  %v1478_v15 = vpop.permute.xlu2 %1477  ;;  %v1587_v17 = vrot.slane %v1585_v11, 4  ;;  %v1586_v41 = vsel %vm2610_vm5, %v2071_v20, %v1585_v11  ;;  %v1066_v9 = vsel %vm2610_vm5, %v1064_v31, %v1065_v44  ;;  %v1063_v53 = vsel %vm2610_vm5, %v2033_v40, %v1062_v34  ;;  %v2051_v11 = vld [vmem:[%s2443_s14 + $0x44] sm:$0x1] }
 0x13a   : > { %1152 = vst.msk [vmem:[#allocation2 + $0x20] sm:$0xf] %vm1143_vm11, %v1112_v55  ;;  %v1052_v8 = vsel %vm2610_vm5, %v1050_v49, %v1051_v35  ;;  %v1546_v35 = vrot.slane %v3250_v59, 5 }
 0x13b   : > { %1262 = vst.msk [vmem:[#allocation2 + $0x24] sm:$0xf] %vm1252_vm13, %v1223_v21  ;;  %v1589_v4 = vsel %vm2610_vm5, %v1587_v17, %v1588_v23  ;;  %v3231_v21 = vld [vmem:[%s2443_s14 + $0x24] sm:$0xf] }
 0x13c   : > { %v1294_v54 = vshrl.u32 %v3231_v21, 16  ;;  %v1297_v46 = vshll.u32 %v3231_v21, 16  ;;  %v2065_v23 = vrot.slane %v3231_v21, 9 }
 0x13e   : > { %1489 = vrot.lane.b32.xlu1 %v1450_v63, %s2338_s8  ;;  %v1296_v60 = vrot.slane %v1294_v54, 4  ;;  %v1299_v62 = vrot.slane %v1297_v46, 5  ;;  %v3255_v63 = vld [vmem:[%s2443_s14 + $0x40] sm:$0xf] }
 0x13f   : > { %1483 = vrot.lane.b32.xlu0 %v1412_v6, %s2338_s8  ;;  %1481 = vrot.lane.b32.xlu2 %v1402_v2, %s2338_s8  ;;  %v1313_v6 = vshll.u32 %v3250_v59, 16  ;;  %v1351_v3 = vshll.u32 %v3255_v63, 16  ;;  %v1355_v42 = vshrl.u32 %v3255_v63, 16  ;;  %v1557_v31 = vrot.slane %v3255_v63, 5 }
 0x140   : > { %v1221_v58 = vpop.permute.xlu1 %1220  ;;  %v1300_v2 = vor.u32 %v1299_v62, %v1296_v60 }
 0x141   : > { %1261 = vst.msk [vmem:[#allocation2 + $0x20] sm:$0xf] %vm1252_vm13, %v1221_v58  ;;  %v1122_v28 = vpop.permute.xlu0 %1121  ;;  %v1488_v61 = vpop.permute.xlu2 %1487  ;;  %v1315_v58 = vrot.slane %v1313_v6, 5  ;;  %v1353_v29 = vrot.slane %v1351_v3, 5  ;;  %v1357_v33 = vrot.slane %v1355_v42, 4  ;;  %v1559_v40 = vrot.slane %v1557_v31, 4 }
 0x142   : > { %1157 = vst.msk [vmem:[#allocation2 + $0x34] sm:$0xf] %vm1143_vm11, %v1122_v28  ;;  %v1301_v28 = vrot.slane %v1300_v2, 4 }
 0x143   : > { %1518 = vst.msk [vmem:[#allocation2 + $0x20] sm:$0xf] %vm1509_vm14, %v1478_v15  ;;  %v1310_v15 = vor.u32 %v1309_v57, %v1305_v56  ;;  %v1358_v19 = vor.u32 %v1357_v33, %v1353_v29 }
 0x144   : > { %v1306_v18 = vsel %vm2478_vm2, %v1301_v28, %v1305_v56 }
 0x145   : > { %v1311_v0 = vrot.slane %v1310_v15, 4  ;;  %v1359_v25 = vrot.slane %v1358_v19, 4 }
 0x146   : > { %1612 = vrot.lane.b32.xlu1 %v1575_v7, %s2339_s9 }
 0x147   : > { %1610 = vrot.lane.b32.xlu0 %v1572_v27, %s2339_s9  ;;  %1491 = vrot.lane.b32.xlu2 %v1460_v1, %s2338_s8  ;;  %v1344_v27 = vrot.slane %v1342_v47, 4  ;;  %v1347_v1 = vrot.slane %v1345_v52, 5  ;;  %v1316_v12 = vsel %vm2478_vm2, %v1311_v0, %v1315_v58 }
 0x148   : > { %v1231_v10 = vpop.permute.xlu1 %1230 }
 0x149   : > { %1266 = vst.msk [vmem:[#allocation2 + $0x34] sm:$0xf] %vm1252_vm13, %v1231_v10  ;;  %v1229_v16 = vpop.permute.xlu0 %1228  ;;  %v1615_v38 = vpop.permute.xlu2 %1614  ;;  %v1361_v10 = vshll.u32 %v2051_v11, 16  ;;  %v1348_v17 = vor.u32 %v1347_v1, %v1344_v27 }
 0x14a   : > { %1265 = vst.msk [vmem:[#allocation2 + $0x30] sm:$0xf] %vm1252_vm13, %v1229_v16  ;;  %v1543_v16 = vrot.slane %v3226_v22, 5 }
 0x14b   : > { %1523 = vst.msk [vmem:[#allocation2 + $0x34] sm:$0xf] %vm1509_vm14, %v1488_v61  ;;  %v1363_v34 = vrot.slane %v1361_v10, 5 }
 0x14c   : > { %v1545_v30 = vrot.slane %v1543_v16, 4 }
 0x14e   : > { %1099 = vrot.lane.b32.xlu1 %v1049_v14, %s2336_s5  ;;  %v1547_v51 = vsel %vm2610_vm5, %v1545_v30, %v1546_v35 }
 0x14f   : > { %1620 = vrot.lane.b32.xlu0 %v1589_v4, %s2339_s9  ;;  %1618 = vrot.lane.b32.xlu2 %v1586_v41, %s2339_s9  ;;  %v1349_v4 = vrot.slane %v1348_v17, 4  ;;  %v1544_v41 = vsel %vm2610_vm5, %v2065_v23, %v1543_v16 }
 0x150   : > { %v1486_v45 = vpop.permute.xlu1 %1485 }
 0x151   : > { %1522 = vst.msk [vmem:[#allocation2 + $0x30] sm:$0xf] %vm1509_vm14, %v1486_v45  ;;  %v1480_v48 = vpop.permute.xlu0 %1479  ;;  %v1098_v32 = vpop.permute.xlu2 %1097  ;;  %v1364_v45 = vsel %vm2478_vm2, %v1359_v25, %v1363_v34  ;;  %v1354_v24 = vsel %vm2478_vm2, %v1349_v4, %v1353_v29  ;;  %v3363_v34 = vld [vmem:[%s3476_s2] ss:$0 sm:$0xff] }
 0x152   : > { %1519 = vst.msk [vmem:[#allocation2 + $0x24] sm:$0xf] %vm1509_vm14, %v1480_v48 }
 0x153   : > { %1651 = vst.msk [vmem:[#allocation2 + $0x30] sm:$0xf] %vm1638_vm15, %v1615_v38 }
 0x154   : > { %1145 = vst.msk [vmem:[#allocation2 + $0x4] sm:$0xf] %vm1143_vm11, %v1098_v32 }
 0x156   : > { %1109 = vrot.lane.b32.xlu1 %v1066_v9, %s2336_s5 }
 0x157   : > { %1107 = vrot.lane.b32.xlu0 %v1063_v53, %s2336_s5  ;;  %1101 = vrot.lane.b32.xlu2 %v1052_v8, %s2336_s5  ;;  %s202_s5 = sand.u32 1, %s2306_s16  }
 0x158   : > { %v1609_v55 = vpop.permute.xlu1 %1608 }
 0x159   : > { %1648 = vst.msk [vmem:[#allocation2 + $0x24] sm:$0xf] %vm1638_vm15, %v1609_v55  ;;  %v1607_v39 = vpop.permute.xlu0 %1606  ;;  %v1205_v37 = vpop.permute.xlu2 %1204 }
 0x15a   : > { %1647 = vst.msk [vmem:[#allocation2 + $0x20] sm:$0xf] %vm1638_vm15, %v1607_v39 }
 0x15e   : > { %1216 = vrot.lane.b32.xlu1 %v3259_v43, %s2337_s6 }
 0x15f   : > { %1210 = vrot.lane.b32.xlu0 %v3226_v22, %s2337_s6  ;;  %1208 = vrot.lane.b32.xlu2 %v3231_v21, %s2337_s6  ;;  %v1560_v22 = vrot.slane %v2051_v11, 5  ;;  %v2067_v21 = vrot.slane %v3259_v43, 9 }
 0x160   : > { %v1096_v5 = vpop.permute.xlu1 %1095 }
 0x161   : > { %1144 = vst.msk [vmem:[#allocation2] sm:$0xf] %vm1143_vm11, %v1096_v5  ;;  %v1617_v7 = vpop.permute.xlu0 %1616  ;;  %v2132_v61 = vld [vmem:[#allocation2 + $0x20] sm:$0xff]  ;;  %v1215_v13 = vpop.permute.xlu2 %1214  ;;  %v1561_v26 = vsel %vm2610_vm5, %v1559_v40, %v1560_v22  ;;  %v1558_v50 = vsel %vm2610_vm5, %v2067_v21, %v1557_v31 }
 0x162   : > { %1652 = vst.msk [vmem:[#allocation2 + $0x34] sm:$0xf] %vm1638_vm15, %v1617_v7  ;;  %2116 = vmatmul.msk.bf16.vlgmr.msra.gmra.mxu2 %vm1731_vm0, %v2132_v61 }
 0x163   : > { %1253 = vst.msk [vmem:[#allocation2] sm:$0xf] %vm1252_vm13, %v1205_v37 }
 0x166   : > { %1467 = vrot.lane.b32.xlu1 %v1316_v12, %s2338_s8 }
 0x167   : > { %1465 = vrot.lane.b32.xlu0 %v1306_v18, %s2338_s8  ;;  %1218 = vrot.lane.b32.xlu2 %v3255_v63, %s2337_s6  ;;  %s1882_s6 = scalar_lea.sflag [#allocation4], %s202_s5 }
 0x168   : > { %v1106_v20 = vpop.permute.xlu1 %1105 }
 0x169   : > { %1149 = vst.msk [vmem:[#allocation2 + $0x14] sm:$0xf] %vm1143_vm11, %v1106_v20  ;;  %v1104_v14 = vpop.permute.xlu0 %1103  ;;  %v2134_v38 = vld [vmem:[#allocation2 + $0x30] sm:$0xff]  ;;  %v1470_v44 = vpop.permute.xlu2 %1469 }
 0x16a   : > { %1148 = vst.msk [vmem:[#allocation2 + $0x10] sm:$0xf] %vm1143_vm11, %v1104_v14  ;;  %2118 = vmatmul.msk.bf16.vlgmr.msra.gmra.mxu3 %vm1731_vm0, %v2134_v38  ;;  %v3369_v14 = vld [vmem:[%s3477_s3] ss:$0 sm:$0xff] }
 0x16b   : > { %1258 = vst.msk [vmem:[#allocation2 + $0x14] sm:$0xf] %vm1252_vm13, %v1215_v13 }
 0x16e   : > { %1594 = vrot.lane.b32.xlu1 %v1544_v41, %s2339_s9 }
 0x16f   : > { %1475 = vrot.lane.b32.xlu0 %v1364_v45, %s2338_s8  ;;  %1473 = vrot.lane.b32.xlu2 %v1354_v24, %s2338_s8  ;;  %s2250_s8 = sshra.s32 %s1900_s30, 4  ;;  %s2251_s8 = int_to_ptr.hbm [resolvable:$true] %s2250_s8 }
 0x170   : > { %v1213_v48 = vpop.permute.xlu1 %1212  ;;  %p2257_p2 = scmp.lt.s32.totalorder %s2251_s8, %s3478_s4 }
 0x171   : > { %1257 = vst.msk [vmem:[#allocation2 + $0x10] sm:$0xf] %vm1252_vm13, %v1213_v48  ;;  %v1207_v49 = vpop.permute.xlu0 %1206  ;;  %v1593_v9 = vpop.permute.xlu2 %1592 }
 0x172   : > { %1254 = vst.msk [vmem:[#allocation2 + $0x4] sm:$0xf] %vm1252_vm13, %v1207_v49 }
 0x173   : > { %1514 = vst.msk [vmem:[#allocation2 + $0x10] sm:$0xf] %vm1509_vm14, %v1470_v44 }
 0x176   : > { %1604 = vrot.lane.b32.xlu1 %v1561_v26, %s2339_s9 }
 0x177   : > { %1602 = vrot.lane.b32.xlu0 %v1558_v50, %s2339_s9  ;;  %1596 = vrot.lane.b32.xlu2 %v1547_v51, %s2339_s9  ;;  %s1991_s9 = sshll.u32 %s202_s5, 7 }
 0x178   : > { %v1464_v32 = vpop.permute.xlu1 %1463  ;;  %s3378_s10 = scalar_lea.vmem [#allocation3], %s1991_s9  ;;  %s2252_s9 = scalar_lea.hbm %s2251_s8, 128 }
 0x179   : > { %1511 = vst.msk [vmem:[#allocation2 + $0x4] sm:$0xf] %vm1509_vm14, %v1464_v32  ;;  %v1462_v53 = vpop.permute.xlu0 %1461  ;;  %v987_v54 = vpop.permute.xlu2 %986  ;;  %s1897_s14 = sshll.u32 %s3378_s10, 4  ;;  %p2253_p13 = scmp.ne.s32.totalorder %s2251_s8, %s2252_s9  ;;  %s1898_s14 = int_to_ptr.vmem [resolvable:$true] %s1897_s14 }
 0x17a   : > { %1510 = vst.msk [vmem:[#allocation2] sm:$0xf] %vm1509_vm14, %v1462_v53  ;;  %p2258_p4 = scmp.lt.s32.totalorder %s2256_s13, %s2252_s9 }
 0x17b   : > { %1640 = vst.msk [vmem:[#allocation2 + $0x4] sm:$0xf] %vm1638_vm15, %v1593_v9  ;;  %p2254_p0 = pnand %p2253_p13, %p2417_p3 }
 0x17c   : > { %1025 = vst.msk [vmem:[#allocation2 + $0x28] sm:$0xf] %vm1014_vm10, %v987_v54  ;;  %p2259_p5 = por %p2258_p4, %p2257_p2 }
 0x17d   : > { %p2255_p1 = pneg %p2254_p0 }
 0x17f   : > { %p2260_p6 = pnand %p2259_p5, %p2255_p1 }
 0x180   : > { %v1591_v46 = vpop.permute.xlu1 %1590 }
 0x181   : > { %1639 = vst.msk [vmem:[#allocation2] sm:$0xf] %vm1638_vm15, %v1591_v46  ;;  %v1472_v36 = vpop.permute.xlu0 %1471  ;;  %v997_v8 = vpop.permute.xlu2 %996 }
 0x182   : > { %1515 = vst.msk [vmem:[#allocation2 + $0x14] sm:$0xf] %vm1509_vm14, %v1472_v36 }
 0x183   : > { %1030 = vst.msk [vmem:[#allocation2 + $0x3c] sm:$0xf] %vm1014_vm10, %v997_v8 }
 0x188   : > { %v1601_v56 = vpop.permute.xlu1 %1600  ;;  %v2128_v57 = vld [vmem:[#allocation2] sm:$0xff] }
 0x189   : > { %1644 = vst.msk [vmem:[#allocation2 + $0x14] sm:$0xf] %vm1638_vm15, %v1601_v56  ;;  %v1599_v55 = vpop.permute.xlu0 %1598  ;;  %2112 = vmatmul.msk.bf16.vlgmr.msra.gmra.mxu0 %vm1731_vm0, %v2128_v57  ;;  %v1124_v59 = vpop.permute.xlu2 %1123 }
 0x18a   : > { %1643 = vst.msk [vmem:[#allocation2 + $0x10] sm:$0xf] %vm1638_vm15, %v1599_v55 }
 0x190   : > { %v995_v60 = vpop.permute.xlu1 %994 }
 0x191   : > { %1029 = vst.msk [vmem:[#allocation2 + $0x38] sm:$0xf] %vm1014_vm10, %v995_v60  ;;  %v989_v62 = vpop.permute.xlu0 %988  ;;  %v2130_v39 = vld [vmem:[#allocation2 + $0x10] sm:$0xff]  ;;  %v1227_v63 = vpop.permute.xlu2 %1226 }
 0x192   : > { %1026 = vst.msk [vmem:[#allocation2 + $0x2c] sm:$0xf] %vm1014_vm10, %v989_v62  ;;  %2114 = vmatmul.msk.bf16.vlgmr.msra.gmra.mxu1 %vm1731_vm0, %v2130_v39 }
 0x193   : > { %1158 = vst.msk [vmem:[#allocation2 + $0x38] sm:$0xf] %vm1143_vm11, %v1124_v59 }
 0x198   : > { %v1118_v43 = vpop.permute.xlu1 %1117 }
 0x199   : > { %1155 = vst.msk [vmem:[#allocation2 + $0x2c] sm:$0xf] %vm1143_vm11, %v1118_v43  ;;  %v1116_v15 = vpop.permute.xlu0 %1115  ;;  %v1482_v6 = vpop.permute.xlu2 %1481 }
 0x19a   : > { %1154 = vst.msk [vmem:[#allocation2 + $0x28] sm:$0xf] %vm1143_vm11, %v1116_v15 }
 0x19b   : > { %1264 = vst.msk [vmem:[#allocation2 + $0x2c] sm:$0xf] %vm1252_vm13, %v1227_v63 }
 0x1a0   : > { %v1225_v37 = vpop.permute.xlu1 %1224 }
 0x1a1   : > { %1263 = vst.msk [vmem:[#allocation2 + $0x28] sm:$0xf] %vm1252_vm13, %v1225_v37  ;;  %v1126_v2 = vpop.permute.xlu0 %1125  ;;  %v1492_v3 = vpop.permute.xlu2 %1491 }
 0x1a2   : > { %1159 = vst.msk [vmem:[#allocation2 + $0x3c] sm:$0xf] %vm1143_vm11, %v1126_v2 }
 0x1a3   : > { %1520 = vst.msk [vmem:[#allocation2 + $0x28] sm:$0xf] %vm1509_vm14, %v1482_v6 }
 0x1a8   : > { %v1235_v42 = vpop.permute.xlu1 %1234 }
 0x1a9   : > { %1268 = vst.msk [vmem:[#allocation2 + $0x3c] sm:$0xf] %vm1252_vm13, %v1235_v42  ;;  %v1233_v47 = vpop.permute.xlu0 %1232  ;;  %v1619_v52 = vpop.permute.xlu2 %1618 }
 0x1aa   : > { %1267 = vst.msk [vmem:[#allocation2 + $0x38] sm:$0xf] %vm1252_vm13, %v1233_v47 }
 0x1ab   : > { %1525 = vst.msk [vmem:[#allocation2 + $0x3c] sm:$0xf] %vm1509_vm14, %v1492_v3 }
 0x1b0   : > { %v1490_v0 = vpop.permute.xlu1 %1489 }
 0x1b1   : > { %1524 = vst.msk [vmem:[#allocation2 + $0x38] sm:$0xf] %vm1509_vm14, %v1490_v0  ;;  %v1484_v58 = vpop.permute.xlu0 %1483  ;;  %v1102_v5 = vpop.permute.xlu2 %1101 }
 0x1b2   : > { %1521 = vst.msk [vmem:[#allocation2 + $0x2c] sm:$0xf] %vm1509_vm14, %v1484_v58 }
 0x1b3   : > { %1653 = vst.msk [vmem:[#allocation2 + $0x38] sm:$0xf] %vm1638_vm15, %v1619_v52 }
 0x1b4   : > { %1147 = vst.msk [vmem:[#allocation2 + $0xc] sm:$0xf] %vm1143_vm11, %v1102_v5 }
 0x1b8   : > { %v1613_v28 = vpop.permute.xlu1 %1612 }
 0x1b9   : > { %1650 = vst.msk [vmem:[#allocation2 + $0x2c] sm:$0xf] %vm1638_vm15, %v1613_v28  ;;  %v1611_v29 = vpop.permute.xlu0 %1610  ;;  %v1209_v33 = vpop.permute.xlu2 %1208 }
 0x1ba   : > { %1649 = vst.msk [vmem:[#allocation2 + $0x28] sm:$0xf] %vm1638_vm15, %v1611_v29 }
 0x1c0   : > { %v1100_v7 = vpop.permute.xlu1 %1099 }
 0x1c1   : > { %1146 = vst.msk [vmem:[#allocation2 + $0x8] sm:$0xf] %vm1143_vm11, %v1100_v7  ;;  %v1621_v61 = vpop.permute.xlu0 %1620  ;;  %v2133_v11 = vld [vmem:[#allocation2 + $0x28] sm:$0xff]  ;;  %v1219_v27 = vpop.permute.xlu2 %1218 }
 0x1c2   : > { %1654 = vst.msk [vmem:[#allocation2 + $0x3c] sm:$0xf] %vm1638_vm15, %v1621_v61  ;;  %2117 = vmatmul.msk.bf16.gmra.mxu2 %vm1731_vm0, %v2133_v11 }
 0x1c3   : > { %1255 = vst.msk [vmem:[#allocation2 + $0x8] sm:$0xf] %vm1252_vm13, %v1209_v33 }
 0x1c8   : > { %v1110_v1 = vpop.permute.xlu1 %1109 }
 0x1c9   : > { %1151 = vst.msk [vmem:[#allocation2 + $0x1c] sm:$0xf] %vm1143_vm11, %v1110_v1  ;;  %v1108_v12 = vpop.permute.xlu0 %1107  ;;  %v2135_v13 = vld [vmem:[#allocation2 + $0x38] sm:$0xff]  ;;  %v1474_v18 = vpop.permute.xlu2 %1473 }
 0x1ca   : > { %1150 = vst.msk [vmem:[#allocation2 + $0x18] sm:$0xf] %vm1143_vm11, %v1108_v12  ;;  %2119 = vmatmul.msk.bf16.gmra.mxu3 %vm1731_vm0, %v2135_v13 }
 0x1cb   : > { %1260 = vst.msk [vmem:[#allocation2 + $0x1c] sm:$0xf] %vm1252_vm13, %v1219_v27 }
 0x1d0   : > { %v1217_v19 = vpop.permute.xlu1 %1216 }
 0x1d1   : > { %1259 = vst.msk [vmem:[#allocation2 + $0x18] sm:$0xf] %vm1252_vm13, %v1217_v19  ;;  %v1211_v10 = vpop.permute.xlu0 %1210  ;;  %v1597_v23 = vpop.permute.xlu2 %1596 }
 0x1d2   : > { %1256 = vst.msk [vmem:[#allocation2 + $0xc] sm:$0xf] %vm1252_vm13, %v1211_v10 }
 0x1d3   : > { %1516 = vst.msk [vmem:[#allocation2 + $0x18] sm:$0xf] %vm1509_vm14, %v1474_v18 }
 0x1d8   : > { %v1468_v17 = vpop.permute.xlu1 %1467 }
 0x1d9   : > { %1513 = vst.msk [vmem:[#allocation2 + $0xc] sm:$0xf] %vm1509_vm14, %v1468_v17  ;;  %v1466_v16 = vpop.permute.xlu0 %1465 }
 0x1da   : > { %1512 = vst.msk [vmem:[#allocation2 + $0x8] sm:$0xf] %vm1509_vm14, %v1466_v16 }
 0x1db   : > { %1642 = vst.msk [vmem:[#allocation2 + $0xc] sm:$0xf] %vm1638_vm15, %v1597_v23 }
 0x1e0   : > { %v1595_v20 = vpop.permute.xlu1 %1594 }
 0x1e1   : > { %1641 = vst.msk [vmem:[#allocation2 + $0x8] sm:$0xf] %vm1638_vm15, %v1595_v20  ;;  %v1476_v25 = vpop.permute.xlu0 %1475 }
 0x1e2   : > { %1517 = vst.msk [vmem:[#allocation2 + $0x1c] sm:$0xf] %vm1509_vm14, %v1476_v25 }
 0x1e5   : > { %v1789_v38 = vpop.f32.mrf.mxu2 }
 0x1e6   : > { %v1821_v4 = vmul.f32 %v3363_v34, %v1789_v38 }
 0x1e8   : > { %v1605_v41 = vpop.permute.xlu1 %1604  ;;  %v2129_v31 = vld [vmem:[#allocation2 + $0x8] sm:$0xff]  ;;  %v1841_v44 = vadd.f32 %v3369_v14, %v1821_v4 }
 0x1e9   : > { %1646 = vst.msk [vmem:[#allocation2 + $0x1c] sm:$0xf] %vm1638_vm15, %v1605_v41  ;;  %v1603_v45 = vpop.permute.xlu0 %1602  ;;  %2113 = vmatmul.msk.bf16.gmra.mxu0 %vm1731_vm0, %v2129_v31 }
 0x1ea   : > { %1645 = vst.msk [vmem:[#allocation2 + $0x18] sm:$0xf] %vm1638_vm15, %v1603_v45  ;;  %v1857_v24 = vmax.f32 %v1841_v44, 0.0 }
 0x1ec   : > { %1873 = vst [vmem:[%s3378_s10 + $0x40] sm:$0xff] %v1857_v24 }
 0x1ed   : > { %v1791_v40 = vpop.f32.mrf.mxu2  ;;  %v1799_v22 = vpop.f32.mrf.mxu3 }
 0x1ee   : > { %v1822_v48 = vmul.f32 %v3363_v34, %v1791_v40  ;;  %v1825_v21 = vmul.f32 %v3363_v34, %v1799_v22 }
 0x1f0   : > { %v1842_v49 = vadd.f32 %v3369_v14, %v1822_v48  ;;  %v1845_v30 = vadd.f32 %v3369_v14, %v1825_v21 }
 0x1f1   : > { %v2131_v35 = vld [vmem:[#allocation2 + $0x18] sm:$0xff] }
 0x1f2   : > { %v1858_v26 = vmax.f32 %v1842_v49, 0.0  ;;  %v1861_v9 = vmax.f32 %v1845_v30, 0.0  ;;  %2115 = vmatmul.msk.bf16.gmra.mxu1 %vm1731_vm0, %v2131_v35 }
 0x1f4   : > { %1874 = vst [vmem:[%s3378_s10 + $0x48] sm:$0xff] %v1858_v26 }
 0x1f5   : > { %1877 = vst [vmem:[%s3378_s10 + $0x60] sm:$0xff] %v1861_v9  ;;  %v1801_v50 = vpop.f32.mrf.mxu3 }
 0x1f6   : > { %v1826_v51 = vmul.f32 %v3363_v34, %v1801_v50 }
 0x1f8   : > { %v1846_v32 = vadd.f32 %v3369_v14, %v1826_v51 }
 0x1fa   : > { %v1862_v53 = vmax.f32 %v1846_v32, 0.0 }
 0x1fc   : > { %1878 = vst [vmem:[%s3378_s10 + $0x68] sm:$0xff] %v1862_v53 }
 0x206   : > { %v1769_v54 = vpop.f32.mrf.mxu0 }
 0x207   : > { %v1813_v46 = vmul.f32 %v3363_v34, %v1769_v54 }
 0x209   : > { %v1833_v36 = vadd.f32 %v3369_v14, %v1813_v46 }
 0x20b   : > { %v1849_v8 = vmax.f32 %v1833_v36, 0.0 }
 0x20d   : > { %1865 = vst [vmem:[%s3378_s10] sm:$0xff] %v1849_v8 }
 0x20e   : > { %v1771_v56 = vpop.f32.mrf.mxu0 }
 0x20f   : > { %v1814_v57 = vmul.f32 %v3363_v34, %v1771_v56  ;;  %v1779_v55 = vpop.f32.mrf.mxu1 }
 0x210   : > { %v1817_v59 = vmul.f32 %v3363_v34, %v1779_v55 }
 0x211   : > { %v1834_v60 = vadd.f32 %v3369_v14, %v1814_v57 }
 0x212   : > { %v1837_v62 = vadd.f32 %v3369_v14, %v1817_v59 }
 0x213   : > { %v1850_v39 = vmax.f32 %v1834_v60, 0.0 }
 0x214   : > { %v1853_v63 = vmax.f32 %v1837_v62, 0.0 }
 0x215   : > { %1866 = vst [vmem:[%s3378_s10 + $0x8] sm:$0xff] %v1850_v39 }
 0x216   : > { %1869 = vst [vmem:[%s3378_s10 + $0x20] sm:$0xff] %v1853_v63 }
 0x217   : > { %v1781_v43 = vpop.f32.mrf.mxu1 }
 0x218   : > { %v1818_v15 = vmul.f32 %v3363_v34, %v1781_v43 }
 0x21a   : > { %v1838_v6 = vadd.f32 %v3369_v14, %v1818_v15 }
 0x21c   : > { %v1854_v37 = vmax.f32 %v1838_v6, 0.0 }
 0x21e   : > { %1870 = vst [vmem:[%s3378_s10 + $0x28] sm:$0xff] %v1854_v37 }
 0x245   : > { %v1794_v2 = vpop.f32.mrf.mxu2 }
 0x246   : > { %v1823_v3 = vmul.f32 %v3363_v34, %v1794_v2 }
 0x248   : > { %v1843_v42 = vadd.f32 %v3369_v14, %v1823_v3 }
 0x24a   : > { %v1859_v47 = vmax.f32 %v1843_v42, 0.0 }
 0x24c   : > { %1875 = vst [vmem:[%s3378_s10 + $0x50] sm:$0xff] %v1859_v47 }
 0x24d   : > { %v1796_v52 = vpop.f32.mrf.mxu2  ;;  %v1804_v0 = vpop.f32.mrf.mxu3 }
 0x24e   : > { %v1824_v58 = vmul.f32 %v3363_v34, %v1796_v52  ;;  %v1827_v5 = vmul.f32 %v3363_v34, %v1804_v0 }
 0x250   : > { %v1844_v28 = vadd.f32 %v3369_v14, %v1824_v58  ;;  %v1847_v29 = vadd.f32 %v3369_v14, %v1827_v5 }
 0x252   : > { %v1860_v33 = vmax.f32 %v1844_v28, 0.0  ;;  %v1863_v7 = vmax.f32 %v1847_v29, 0.0 }
 0x254   : > { %1876 = vst [vmem:[%s3378_s10 + $0x58] sm:$0xff] %v1860_v33 }
 0x255   : > { %1879 = vst [vmem:[%s3378_s10 + $0x70] sm:$0xff] %v1863_v7  ;;  %v1806_v61 = vpop.f32.mrf.mxu3 }
 0x256   : > { %v1828_v11 = vmul.f32 %v3363_v34, %v1806_v61 }
 0x258   : > { %v1848_v27 = vadd.f32 %v3369_v14, %v1828_v11 }
 0x25a   : > { %v1864_v1 = vmax.f32 %v1848_v27, 0.0 }
 0x25c   : > { %1880 = vst [vmem:[%s3378_s10 + $0x78] sm:$0xff] %v1864_v1 }
 0x266   : > { %v1774_v12 = vpop.f32.mrf.mxu0 }
 0x267   : > { %v1815_v13 = vmul.f32 %v3363_v34, %v1774_v12 }
 0x269   : > { %v1835_v18 = vadd.f32 %v3369_v14, %v1815_v13 }
 0x26b   : > { %v1851_v19 = vmax.f32 %v1835_v18, 0.0 }
 0x26d   : > { %1867 = vst [vmem:[%s3378_s10 + $0x10] sm:$0xff] %v1851_v19 }
 0x26e   : > { %v1776_v10 = vpop.f32.mrf.mxu0 }
 0x26f   : > { %v1816_v17 = vmul.f32 %v3363_v34, %v1776_v10  ;;  %v1784_v23 = vpop.f32.mrf.mxu1 }
 0x270   : > { %v1819_v16 = vmul.f32 %v3363_v34, %v1784_v23 }
 0x271   : > { %v1836_v20 = vadd.f32 %v3369_v14, %v1816_v17 }
 0x272   : > { %v1839_v25 = vadd.f32 %v3369_v14, %v1819_v16 }
 0x273   : > { %v1852_v38 = vmax.f32 %v1836_v20, 0.0 }
 0x274   : > { %v1855_v4 = vmax.f32 %v1839_v25, 0.0 }
 0x275   : > { %1868 = vst [vmem:[%s3378_s10 + $0x18] sm:$0xff] %v1852_v38 }
 0x276   : > { %1871 = vst [vmem:[%s3378_s10 + $0x30] sm:$0xff] %v1855_v4 }
 0x277   : > { %v1786_v41 = vpop.f32.mrf.mxu1 }
 0x278   : > { %v1820_v31 = vmul.f32 %v3363_v34, %v1786_v41 }
 0x27a   : > { %v1840_v44 = vadd.f32 %v3369_v14, %v1820_v31 }
 0x27c   : > { %v1856_v45 = vmax.f32 %v1840_v44, 0.0 }
 0x27e   : > { %1872 = vst [vmem:[%s3378_s10 + $0x38] sm:$0xff] %v1856_v45 }
 0x27f   : > { %2263 = shalt.err (!%p2260_p6)
}
 0x280   : > { %s2340_s5 = smov 128  }
 0x281   : > { %2149 = dma.vmem_to_hbm [thread:$0]  (%p2417_p3), %s1898_s14, 2048, %s1900_s30, %s1882_s6, %s2340_s5, %s2340_s5, %s2333_s24  }
 0x282 PF: > { %p2155_p7 = scmp.ge.s32.totalorder %s2330_s22, 2  ;;  %s1914_s10 = sand.u32 1, %s2302_s15  }
 0x283   : > { %s1915_s19 = scalar_lea.sflag [#allocation4], %s1914_s10 }
 0x284   : > { %p2152_p9 = pnand %p2155_p7, %p2426_p8 }
 0x286   : > { %p2153_p10 = pneg %p2152_p9 }
 0x288   : > { %2297 = dma.done.wait (%p2153_p10), %s1915_s19, 2048  }
 0x289   : > { %2299 = vsyncadd (%p2153_p10), %s1915_s19, 4294965248  ;;  %s17_s22 = sadd.s32 1, %s2330_s22   ;;  %s3485_s15 = smov %s2306_s16 }
 0x28a   : > { %p14_p11 = scmp.ge.s32.totalorder %s17_s22, 6   ;;  %s3486_s16 = smov %s2310_s17 }
 0x28b   : > { %s3487_s17 = smov %s2435_s7  ;;  %s3488_s18 = smov %s2322_s20 }
 0x28c   : > { %s3489_s19 = smov %s2326_s21  ;;  %s3490_s20 = smov %s3493_s25 }
 0x28d   : > { %s3491_s21 = smov %s3497_s26  ;;  %16 = sbr.rel (!%p14_p11) target bundleno = 5 (0x5), region = 74 }
 0x292   :  { %1921 = vsyncpa [#allocation4], 1 }
 0x293   :  { %1923 = vsyncpa [#allocation4 + $0x1], 1 }

</bundles_post_ra>
